<compile_context>
chip_gen: v5e
topology: v5e:2x2
jax: 0.10.0
libtpu: 0.0.40
codegen_flags: <defaults>
</compile_context>

<pallas_src>
import jax
import jax.numpy as jnp
from jax.experimental import pallas as pl
from jax.experimental.pallas import tpu as pltpu


# ----------------------------------------------------------------------------
# Kernel: K-tiled orth projection with f32 accumulator, then (on the last K
# step) the 2 hidden FC(+ReLU) layers + final linear, all on the MXU.
# ----------------------------------------------------------------------------
def elm_kernel(x_ref, orth_ref, w1_ref, b1_ref, w2_ref, b2_ref, wf_ref, bf_ref,
               out_ref, acc_ref):
    k = pl.program_id(1)

    @pl.when(k == 0)
    def _():
        acc_ref[...] = jnp.zeros_like(acc_ref)

    # bf16 x bf16 -> f32 accumulate (MXU native path on v5e/v6e/v7x).
    acc_ref[...] += jnp.dot(x_ref[...], orth_ref[...],
                            preferred_element_type=jnp.float32)

    @pl.when(k == pl.num_programs(1) - 1)
    def _():
        emb = acc_ref[...]                                          # (bm, emb) f32
        # FCBlock 1: Linear + ReLU
        h = jnp.dot(emb, w1_ref[...], preferred_element_type=jnp.float32) + b1_ref[...]
        h = jnp.maximum(h, 0.0)
        # FCBlock 2: Linear + ReLU
        h = jnp.dot(h, w2_ref[...], preferred_element_type=jnp.float32) + b2_ref[...]
        h = jnp.maximum(h, 0.0)
        # FinalBlock: Linear (lane-padded to 128 classes)
        out = jnp.dot(h, wf_ref[...], preferred_element_type=jnp.float32) + bf_ref[...]
        out_ref[...] = out.astype(out_ref.dtype)


def elm_forward(x_flat, orth, w1, b1, w2, b2, wf, bf, *, tk=3072, bm_max=256):
    """x_flat: (B, 12288) float32. Returns (B, num_classes) float32."""
    b, in_dim = x_flat.shape
    emb = orth.shape[1]
    width = w1.shape[1]
    num_classes = wf.shape[1]

    assert in_dim % tk == 0, "K tile must divide 12288"

    # bf16 activations pack 16 sublanes per vreg -> pad batch to multiple of 16.
    b_pad = ((b + 15) // 16) * 16
    bm = min(bm_max, b_pad)
    b_pad = ((b_pad + bm - 1) // bm) * bm          # make bm divide b_pad

    # Lane-dense output: pad classes up to a multiple of 128 lanes.
    n_pad = ((num_classes + 127) // 128) * 128

    x_p = jnp.pad(x_flat.astype(jnp.bfloat16), ((0, b_pad - b), (0, 0)))
    wf_p = jnp.pad(wf, ((0, 0), (0, n_pad - num_classes)))
    bf_p = jnp.pad(bf, ((0, 0), (0, n_pad - num_classes)))

    num_m = b_pad // bm
    num_k = in_dim // tk

    grid_spec = pltpu.PrefetchScalarGridSpec(
        num_scalar_prefetch=0,
        grid=(num_m, num_k),
        in_specs=[
            pl.BlockSpec((bm, tk), lambda i, k: (i, k)),          # x (bf16)
            pl.BlockSpec((tk, emb), lambda i, k: (k, 0)),         # orth (bf16)
            pl.BlockSpec((emb, width), lambda i, k: (0, 0)),      # w1
            pl.BlockSpec((1, width), lambda i, k: (0, 0)),        # b1
            pl.BlockSpec((width, width), lambda i, k: (0, 0)),    # w2
            pl.BlockSpec((1, width), lambda i, k: (0, 0)),        # b2
            pl.BlockSpec((width, n_pad), lambda i, k: (0, 0)),    # wf (padded)
            pl.BlockSpec((1, n_pad), lambda i, k: (0, 0)),        # bf (padded)
        ],
        out_specs=pl.BlockSpec((bm, n_pad), lambda i, k: (i, 0)),
        scratch_shapes=[pltpu.VMEM((bm, emb), jnp.float32)],
    )

    out = pl.pallas_call(
        elm_kernel,
        out_shape=jax.ShapeDtypeStruct((b_pad, n_pad), jnp.float32),
        grid_spec=grid_spec,
        compiler_params=pltpu.CompilerParams(
            dimension_semantics=("parallel", "arbitrary")),
    )(x_p, orth, w1, b1, w2, b2, wf_p, bf_p)

    return out[:b, :num_classes]


# ----------------------------------------------------------------------------
# Deterministic parameter construction (mirrors __init__ shapes).
# ----------------------------------------------------------------------------
def make_params(key, in_dim, emb, width, num_classes):
    k_orth, k1, kb1, k2, kb2, kf, kbf = jax.random.split(key, 7)

    # torch.nn.init.orthogonal_(torch.empty(12288, emb)).half()
    # Stored reduced-precision; bf16 is the native MXU input type on TPU.
    orth = jax.nn.initializers.orthogonal()(k_orth, (in_dim, emb), jnp.float32)
    orth = orth.astype(jnp.bfloat16)

    def linear(kw, kb, fan_in, fan_out):
        # torch Linear default: U(-1/sqrt(fan_in), 1/sqrt(fan_in)), W:(out,in)
        lim = 1.0 / jnp.sqrt(jnp.float32(fan_in))
        w = jax.random.uniform(kw, (fan_out, fan_in), jnp.float32, -lim, lim)
        bb = jax.random.uniform(kb, (fan_out,), jnp.float32, -lim, lim)
        # kernel consumes W transposed: (in, out), bias as (1, out)
        return w.T, bb.reshape(1, fan_out)

    w1, b1 = linear(k1, kb1, emb, width)
    w2, b2 = linear(k2, kb2, width, width)
    wf, bf = linear(kf, kbf, width, num_classes)
    return orth, w1, b1, w2, b2, wf, bf


def reference_forward(x_flat, orth, w1, b1, w2, b2, wf, bf):
    hp = jax.lax.Precision.HIGHEST
    x32 = x_flat.astype(jnp.bfloat16).astype(jnp.float32)   # same bf16 inputs as kernel
    o32 = orth.astype(jnp.float32)
    h = jnp.dot(x32, o32, precision=hp)
    h = jnp.maximum(jnp.dot(h, w1, precision=hp) + b1, 0.0)
    h = jnp.maximum(jnp.dot(h, w2, precision=hp) + b2, 0.0)
    return jnp.dot(h, wf, precision=hp) + bf


if __name__ == "__main__":
    # Small config consistent with the module: tiny-imagenet images are
    # (3,64,64) -> 12288 features (hard-coded by the forward), small emb/width.
    B, C, H, W = 2, 3, 64, 64
    IN_DIM = C * H * W          # 12288 (fixed by the module's .view)
    EMB = 128                   # opt.emb
    WIDTH = 128                 # opt.width
    NUM_CLASSES = 16            # opt num classes (small)

    key = jax.random.PRNGKey(0)
    k_x, k_p = jax.random.split(key)

    x = jax.random.normal(k_x, (B, C, H, W), jnp.float32)
    params = make_params(k_p, IN_DIM, EMB, WIDTH, NUM_CLASSES)

    # torch: _x.view(B, 1, 12288) flattens C,H,W in row-major order — same as
    # a row-major reshape of the NCHW array here.
    x_flat = x.reshape(B, IN_DIM)

    out = elm_forward(x_flat, *params)
    out = jax.block_until_ready(out)

    ref = reference_forward(x_flat, *params)
    assert out.shape == (B, NUM_CLASSES)
    assert jnp.allclose(out, ref, atol=1e-2, rtol=1e-2), "mismatch vs JAX reference"

    print("KERNEL_OK")
</pallas_src>

<mosaic_0001>
module attributes {stable_mosaic.version = 11 : i64} {
  func.func @elm_kernel(%arg0: i32, %arg1: i32, %arg2: memref<16x3072xbf16, #tpu.memory_space<vmem>>, %arg3: memref<3072x128xbf16, #tpu.memory_space<vmem>>, %arg4: memref<128x128xf32, #tpu.memory_space<vmem>>, %arg5: memref<1x128xf32, #tpu.memory_space<vmem>>, %arg6: memref<128x128xf32, #tpu.memory_space<vmem>>, %arg7: memref<1x128xf32, #tpu.memory_space<vmem>>, %arg8: memref<128x128xf32, #tpu.memory_space<vmem>>, %arg9: memref<1x128xf32, #tpu.memory_space<vmem>>, %arg10: memref<16x128xf32, #tpu.memory_space<vmem>>, %arg11: memref<16x128xf32, #tpu.memory_space<vmem>>) attributes {dimension_semantics = [#tpu.dimension_semantics<parallel>, #tpu.dimension_semantics<arbitrary>], iteration_bounds = array<i64: 1, 4>, scalar_prefetch = 0 : i64, scratch_operands = 1 : i64, tpu.core_type = #tpu.core_type<tc>, window_params = [{transform_indices = @transform_0, window_bounds = array<i64: 16, 3072>}, {transform_indices = @transform_1, window_bounds = array<i64: 3072, 128>}, {pipeline_mode = #tpu.pipeline_mode<synchronous>, transform_indices = @transform_2, window_bounds = array<i64: 128, 128>}, {pipeline_mode = #tpu.pipeline_mode<synchronous>, transform_indices = @transform_3, window_bounds = array<i64: 1, 128>}, {pipeline_mode = #tpu.pipeline_mode<synchronous>, transform_indices = @transform_4, window_bounds = array<i64: 128, 128>}, {pipeline_mode = #tpu.pipeline_mode<synchronous>, transform_indices = @transform_5, window_bounds = array<i64: 1, 128>}, {pipeline_mode = #tpu.pipeline_mode<synchronous>, transform_indices = @transform_6, window_bounds = array<i64: 128, 128>}, {pipeline_mode = #tpu.pipeline_mode<synchronous>, transform_indices = @transform_7, window_bounds = array<i64: 1, 128>}, {transform_indices = @transform_8, window_bounds = array<i64: 16, 128>}]} {
    %c0_i32 = arith.constant 0 : i32
    %0 = arith.cmpi eq, %arg1, %c0_i32 : i32
    %1 = arith.extui %0 : i1 to i32
    %c0_i32_0 = arith.constant 0 : i32
    %2 = arith.cmpi ne, %1, %c0_i32_0 : i32
    scf.if %2 {
      %cst_9 = arith.constant 0.000000e+00 : f32
      %12 = vector.broadcast %cst_9 : f32 to vector<16x128xf32>
      %c0_10 = arith.constant 0 : index
      %c0_11 = arith.constant 0 : index
      %13 = vector.load %arg11[%c0_10, %c0_11] : memref<16x128xf32, #tpu.memory_space<vmem>>, vector<16x128xf32>
      tpu.vector_store %arg11[%c0_10, %c0_11], %12 {strides = array<i32>} : memref<16x128xf32, #tpu.memory_space<vmem>>, vector<16x128xf32>,
    } else {
    }
    %c0 = arith.constant 0 : index
    %c0_1 = arith.constant 0 : index
    %3 = vector.load %arg11[%c0, %c0_1] : memref<16x128xf32, #tpu.memory_space<vmem>>, vector<16x128xf32>
    %c0_2 = arith.constant 0 : index
    %c0_3 = arith.constant 0 : index
    %4 = vector.load %arg2[%c0_2, %c0_3] : memref<16x3072xbf16, #tpu.memory_space<vmem>>, vector<16x3072xbf16>
    %c0_4 = arith.constant 0 : index
    %c0_5 = arith.constant 0 : index
    %5 = vector.load %arg3[%c0_4, %c0_5] : memref<3072x128xbf16, #tpu.memory_space<vmem>>, vector<3072x128xbf16>
    %cst = arith.constant dense<0.000000e+00> : vector<16x128xf32>
    %6 = tpu.matmul %4, %5, %cst {dimension_numbers = #tpu.dot_dimension_numbers<[1], [0], [0], [1], [0, 0, 1, 1], [], []>} : vector<16x3072xbf16>, vector<3072x128xbf16>, vector<16x128xf32> -> vector<16x128xf32>
    %7 = arith.addf %3, %6 : vector<16x128xf32>
    %c0_6 = arith.constant 0 : index
    %c0_7 = arith.constant 0 : index
    %8 = vector.load %arg11[%c0_6, %c0_7] : memref<16x128xf32, #tpu.memory_space<vmem>>, vector<16x128xf32>
    tpu.vector_store %arg11[%c0_6, %c0_7], %7 {strides = array<i32>} : memref<16x128xf32, #tpu.memory_space<vmem>>, vector<16x128xf32>,
    %c3_i32 = arith.constant 3 : i32
    %9 = arith.cmpi eq, %arg1, %c3_i32 : i32
    %10 = arith.extui %9 : i1 to i32
    %c0_i32_8 = arith.constant 0 : i32
    %11 = arith.cmpi ne, %10, %c0_i32_8 : i32
    scf.if %11 {
      %c0_9 = arith.constant 0 : index
      %c0_10 = arith.constant 0 : index
      %12 = vector.load %arg11[%c0_9, %c0_10] : memref<16x128xf32, #tpu.memory_space<vmem>>, vector<16x128xf32>
      %c0_11 = arith.constant 0 : index
      %c0_12 = arith.constant 0 : index
      %13 = vector.load %arg4[%c0_11, %c0_12] : memref<128x128xf32, #tpu.memory_space<vmem>>, vector<128x128xf32>
      %cst_13 = arith.constant dense<0.000000e+00> : vector<16x128xf32>
      %14 = tpu.matmul %12, %13, %cst_13 {dimension_numbers = #tpu.dot_dimension_numbers<[1], [0], [0], [1], [0, 0, 1, 1], [], []>} : vector<16x128xf32>, vector<128x128xf32>, vector<16x128xf32> -> vector<16x128xf32>
      %c0_14 = arith.constant 0 : index
      %c0_15 = arith.constant 0 : index
      %15 = vector.load %arg5[%c0_14, %c0_15] : memref<1x128xf32, #tpu.memory_space<vmem>>, vector<1x128xf32>
      %16 = vector.broadcast %15 : vector<1x128xf32> to vector<16x128xf32>
      %17 = arith.addf %14, %16 : vector<16x128xf32>
      %cst_16 = arith.constant 0.000000e+00 : f32
      %18 = vector.broadcast %cst_16 : f32 to vector<16x128xf32>
      %19 = arith.maximumf %17, %18 : vector<16x128xf32>
      %c0_17 = arith.constant 0 : index
      %c0_18 = arith.constant 0 : index
      %20 = vector.load %arg6[%c0_17, %c0_18] : memref<128x128xf32, #tpu.memory_space<vmem>>, vector<128x128xf32>
      %cst_19 = arith.constant dense<0.000000e+00> : vector<16x128xf32>
      %21 = tpu.matmul %19, %20, %cst_19 {dimension_numbers = #tpu.dot_dimension_numbers<[1], [0], [0], [1], [0, 0, 1, 1], [], []>} : vector<16x128xf32>, vector<128x128xf32>, vector<16x128xf32> -> vector<16x128xf32>
      %c0_20 = arith.constant 0 : index
      %c0_21 = arith.constant 0 : index
      %22 = vector.load %arg7[%c0_20, %c0_21] : memref<1x128xf32, #tpu.memory_space<vmem>>, vector<1x128xf32>
      %23 = vector.broadcast %22 : vector<1x128xf32> to vector<16x128xf32>
      %24 = arith.addf %21, %23 : vector<16x128xf32>
      %cst_22 = arith.constant 0.000000e+00 : f32
      %25 = vector.broadcast %cst_22 : f32 to vector<16x128xf32>
      %26 = arith.maximumf %24, %25 : vector<16x128xf32>
      %c0_23 = arith.constant 0 : index
      %c0_24 = arith.constant 0 : index
      %27 = vector.load %arg8[%c0_23, %c0_24] : memref<128x128xf32, #tpu.memory_space<vmem>>, vector<128x128xf32>
      %cst_25 = arith.constant dense<0.000000e+00> : vector<16x128xf32>
      %28 = tpu.matmul %26, %27, %cst_25 {dimension_numbers = #tpu.dot_dimension_numbers<[1], [0], [0], [1], [0, 0, 1, 1], [], []>} : vector<16x128xf32>, vector<128x128xf32>, vector<16x128xf32> -> vector<16x128xf32>
      %c0_26 = arith.constant 0 : index
      %c0_27 = arith.constant 0 : index
      %29 = vector.load %arg9[%c0_26, %c0_27] : memref<1x128xf32, #tpu.memory_space<vmem>>, vector<1x128xf32>
      %30 = vector.broadcast %29 : vector<1x128xf32> to vector<16x128xf32>
      %31 = arith.addf %28, %30 : vector<16x128xf32>
      %c0_28 = arith.constant 0 : index
      %c0_29 = arith.constant 0 : index
      %32 = vector.load %arg10[%c0_28, %c0_29] : memref<16x128xf32, #tpu.memory_space<vmem>>, vector<16x128xf32>
      tpu.vector_store %arg10[%c0_28, %c0_29], %31 {strides = array<i32>} : memref<16x128xf32, #tpu.memory_space<vmem>>, vector<16x128xf32>,
    } else {
    }
    return
  }
  func.func @transform_0(%arg0: i32, %arg1: i32) -> (i32, i32) {
    %c0_i32 = arith.constant 0 : i32
    return %arg0, %arg1 : i32, i32
  }
  func.func @transform_1(%arg0: i32, %arg1: i32) -> (i32, i32) {
    %c0_i32 = arith.constant 0 : i32
    %c0_i32_0 = arith.constant 0 : i32
    return %arg1, %c0_i32 : i32, i32
  }
  func.func @transform_2(%arg0: i32, %arg1: i32) -> (i32, i32) {
    %c0_i32 = arith.constant 0 : i32
    %c0_i32_0 = arith.constant 0 : i32
    %c0_i32_1 = arith.constant 0 : i32
    return %c0_i32, %c0_i32_0 : i32, i32
  }
  func.func @transform_3(%arg0: i32, %arg1: i32) -> (i32, i32) {
    %c0_i32 = arith.constant 0 : i32
    %c0_i32_0 = arith.constant 0 : i32
    %c0_i32_1 = arith.constant 0 : i32
    return %c0_i32, %c0_i32_0 : i32, i32
  }
  func.func @transform_4(%arg0: i32, %arg1: i32) -> (i32, i32) {
    %c0_i32 = arith.constant 0 : i32
    %c0_i32_0 = arith.constant 0 : i32
    %c0_i32_1 = arith.constant 0 : i32
    return %c0_i32, %c0_i32_0 : i32, i32
  }
  func.func @transform_5(%arg0: i32, %arg1: i32) -> (i32, i32) {
    %c0_i32 = arith.constant 0 : i32
    %c0_i32_0 = arith.constant 0 : i32
    %c0_i32_1 = arith.constant 0 : i32
    return %c0_i32, %c0_i32_0 : i32, i32
  }
  func.func @transform_6(%arg0: i32, %arg1: i32) -> (i32, i32) {
    %c0_i32 = arith.constant 0 : i32
    %c0_i32_0 = arith.constant 0 : i32
    %c0_i32_1 = arith.constant 0 : i32
    return %c0_i32, %c0_i32_0 : i32, i32
  }
  func.func @transform_7(%arg0: i32, %arg1: i32) -> (i32, i32) {
    %c0_i32 = arith.constant 0 : i32
    %c0_i32_0 = arith.constant 0 : i32
    %c0_i32_1 = arith.constant 0 : i32
    return %c0_i32, %c0_i32_0 : i32, i32
  }
  func.func @transform_8(%arg0: i32, %arg1: i32) -> (i32, i32) {
    %c0_i32 = arith.constant 0 : i32
    %c0_i32_0 = arith.constant 0 : i32
    return %arg0, %c0_i32 : i32, i32
  }
}

</mosaic_0001>

<bundles_post_ra>
// kernel: tpu_custom_call.1
= control target key start
LH: loop header
LB: loop body
LE: loop exit
PB: predicated region body
PF: predicated region fallthrough
CT: control target
= control target key end

     0   :  { %s4888_s0 = inlined_call_operand.hbm [shape: bf16[16,12288], index: 0, kind: input, shape index: {}]   ;;  %s4889_s1 = inlined_call_operand.hbm [shape: bf16[12288,128], index: 1, kind: input, shape index: {}]   ;;  %s4890_s2 = inlined_call_operand.hbm [shape: f32[128,128], index: 2, kind: input, shape index: {}]   ;;  %s4891_s3 = inlined_call_operand.hbm [shape: f32[1,128], index: 3, kind: input, shape index: {}]   ;;  %s4892_s4 = inlined_call_operand.hbm [shape: f32[128,128], index: 4, kind: input, shape index: {}]   ;;  %s4893_s5 = inlined_call_operand.hbm [shape: f32[1,128], index: 5, kind: input, shape index: {}]   ;;  %s4894_s6 = inlined_call_operand.hbm [shape: f32[128,128], index: 6, kind: input, shape index: {}]   ;;  %s4895_s7 = inlined_call_operand.hbm [shape: f32[1,128], index: 7, kind: input, shape index: {}]   ;;  %s4896_s8 = inlined_call_operand.hbm [shape: f32[16,128], index: 8, kind: output, shape index: {}]  }
   0x1   :  { %4898 = sst [smem:[#allocation26_spill]] %s4888_s0 }
   0x2   :  { %4899 = sst [smem:[#allocation27_spill]] %s4890_s2 }
   0x3   :  { %4900 = sst [smem:[#allocation28_spill]] %s4891_s3 }
   0x4   :  { %4901 = sst [smem:[#allocation29_spill]] %s4892_s4 }
   0x5   :  { %4902 = sst [smem:[#allocation30_spill]] %s4893_s5 }
   0x6   :  { %4903 = sst [smem:[#allocation31_spill]] %s4894_s6 }
   0x7   :  { %4904 = sst [smem:[#allocation32_spill]] %s4895_s7 }
   0x8   :  { %13 = vsyncpa [#allocation4], 0 }
   0x9   :  { %15 = vsyncpa [#allocation4 + $0x1], 0 }
   0xa   :  { %16 = vsyncpa [#allocation7], 0 }
   0xb   :  { %18 = vsyncpa [#allocation7 + $0x1], 0 }
   0xc   :  { %19 = vsyncpa [#allocation10], 0 }
   0xd   :  { %20 = vsyncpa [#allocation13], 0 }
   0xe   :  { %21 = vsyncpa [#allocation16], 0 }
   0xf   :  { %22 = vsyncpa [#allocation5], 0  ;;  %s4475_s27 = smov 0   ;;  %s4477_s28 = smov 0  }
  0x10   :  { %s4479_s29 = smov 0   ;;  %s4481_s30 = smov 0  }
  0x11   :  { %s4483_s9 = smov 0   ;;  %s4485_s10 = smov 0  }
  0x12 LB: > { %s4506_s11 = sadd.s32 4294967295, %s4411_s10   ;;  %p2803_p0 = scmp.ge.s32.totalorder %s4411_s10, 1  ;;  %s4411_s10 = sphi %s4485_s10, %s28_s10   ;;  %s4407_s9 = sphi %s4483_s9, %s4922_s9   ;;  %s4403_s30 = sphi %s4481_s30, %s4921_s30   ;;  %s4399_s29 = sphi %s4479_s29, %s4920_s29   ;;  %s4395_s28 = sphi %s4477_s28, %s4919_s28   ;;  %s4391_s27 = sphi %s4475_s27, %s4918_s27  }
  0x13   : > { %p63_p1 = scmp.eq.s32.totalorder %s4506_s11, 0  ;;  %p251_p2 = scmp.lt.s32.totalorder %s4411_s10, 5 }
  0x14   : > { %s4905_s2 = sld [smem:[#allocation27_spill]]  ;;  %s4413_s16 = smov [#allocation8]  }
  0x15   : > { %p4514_p3 = pnand %p2803_p0, %p251_p2  ;;  %s264_s17 = sshll.u32 %s4413_s16, 4  ;;  %s265_s17 = int_to_ptr.vmem [resolvable:$true] %s264_s17 }
  0x16   : > { %s4908_s3 = sld [smem:[#allocation28_spill]]  ;;  %s4414_s22 = smov 128  }
  0x17   : > { %p3960_p4 = pneg %p4514_p3  ;;  %s4415_s23 = smov 8  }
  0x18   : > { %s4416_s24 = smov [#allocation9]   ;;  %s4909_s5 = sld [smem:[#allocation30_spill]] }
  0x19   : > { %p4522_p5 = pnand %p3960_p4, %p63_p1  ;;  %s279_s25 = sshll.u32 %s4416_s24, 4  ;;  %s280_s25 = int_to_ptr.vmem [resolvable:$true] %s279_s25 }
  0x1a   : > { %s262_s14 = sshll.u32 %s4905_s2, 4  ;;  %s4910_s4 = sld [smem:[#allocation29_spill]]  ;;  %s263_s14 = int_to_ptr.hbm [resolvable:$true] %s262_s14 }
  0x1b   : > { %3963 = dma.hbm_to_vmem [thread:$0]  (!%p4522_p5), %s263_s14, 2048, %s265_s17, [#allocation7], %s4414_s22, %s4414_s22, %s4415_s23  }
  0x1c   : > { %s277_s21 = sshll.u32 %s4908_s3, 4  ;;  %s4417_s2 = smov [#allocation12]   ;;  %s278_s21 = int_to_ptr.hbm [resolvable:$true] %s277_s21 }
  0x1d   : > { %3966 = dma.hbm_to_vmem [thread:$0]  (!%p4522_p5), %s278_s21, 16, %s280_s25, [#allocation10]  }
  0x1e   : > { %s303_s13 = sshll.u32 %s4909_s5, 4  ;;  %s305_s3 = sshll.u32 %s4417_s2, 4  ;;  %s304_s13 = int_to_ptr.hbm [resolvable:$true] %s303_s13  ;;  %s306_s3 = int_to_ptr.vmem [resolvable:$true] %s305_s3 }
  0x1f   : > { %3972 = dma.hbm_to_vmem [thread:$0]  (!%p4522_p5), %s304_s13, 16, %s306_s3, [#allocation13]  }
  0x20   : > { %s288_s20 = sshll.u32 %s4910_s4, 4  ;;  %s4418_s14 = smov [#allocation11]   ;;  %s289_s20 = int_to_ptr.hbm [resolvable:$true] %s288_s20 }
  0x21   : > { %s290_s17 = sshll.u32 %s4418_s14, 4  ;;  %s4911_s6 = sld [smem:[#allocation31_spill]]  ;;  %s291_s17 = int_to_ptr.vmem [resolvable:$true] %s290_s17 }
  0x22   : > { %3969 = dma.hbm_to_vmem [thread:$0]  (!%p4522_p5), %s289_s20, 2048, %s291_s17, [#allocation10], %s4414_s22, %s4414_s22, %s4415_s23  }
  0x23   : > { %s4912_s7 = sld [smem:[#allocation32_spill]]  ;;  %s4419_s12 = smov [#allocation14]  }
  0x24   : > { %s316_s13 = sshll.u32 %s4419_s12, 4  ;;  %s4420_s16 = smov [#allocation15]   ;;  %s317_s13 = int_to_ptr.vmem [resolvable:$true] %s316_s13 }
  0x25   : > { %s331_s19 = sshll.u32 %s4420_s16, 4  ;;  %s37_s20 = sadd.s32 1, %s4407_s9  ;;  %s332_s19 = int_to_ptr.vmem [resolvable:$true] %s331_s19 }
  0x26   : > { %s49_s14 = sadd.s32 1, %s4399_s29  ;;  %p38_p6 = scmp.ge.s32.totalorder %s37_s20, 4 }
  0x27   : > { %s314_s21 = sshll.u32 %s4911_s6, 4  ;;  %p56_p7 = scmp.ne.s32.totalorder %s4399_s29, %s4395_s28  ;;  %s315_s21 = int_to_ptr.hbm [resolvable:$true] %s314_s21 }
  0x28   : > { %3975 = dma.hbm_to_vmem [thread:$0]  (!%p4522_p5), %s315_s21, 2048, %s317_s13, [#allocation13], %s4414_s22, %s4414_s22, %s4415_s23  }
  0x29   : > { %s329_s3 = sshll.u32 %s4912_s7, 4  ;;  %p57_p8 = scmp.eq.s32.totalorder %s4411_s10, 0  ;;  %s330_s3 = int_to_ptr.hbm [resolvable:$true] %s329_s3 }
  0x2a   : > { %3978 = dma.hbm_to_vmem [thread:$0]  (!%p4522_p5), %s330_s3, 16, %s332_s19, [#allocation16]  }
  0x2b   : > { %p62_p9 = scmp.ne.s32.totalorder %s4395_s28, %s4391_s27  ;;  %s4924_s20 = smov (%p38_p6, %s37_s20), 0 }
  0x2c   : > { %4913 = sst [smem:[#allocation25_spill]] %s4924_s20  ;;  %p58_p10 = por %p57_p8, %p56_p7 }
  0x2d   : > { %p4564_p11 = por %p63_p1, %p62_p9  ;;  %s45_s23 = ssub.s32 %s4407_s9, %s4924_s20 }
  0x2e   : > { %p3992_p12 = scmp.lt.s32.totalorder %s4411_s10, 4  ;;  %p47_p13 = scmp.eq.s32.totalorder %s45_s23, 0 }
  0x2f   : > { %s342_s18 = sand.u32 1, %s4399_s29   ;;  %s3690_s26 = smul.u32 96, %s4407_s9 }
  0x30   : > { %s3924_s17 = smul.u32 192, %s342_s18  ;;  %p4576_p0 = pnand %p3992_p12, %p58_p10 }
  0x31   : > { %s4573_s24 = scalar_select %p47_p13, %s4399_s29, %s49_s14  }
  0x32   : > { %s346_s27 = scalar_lea.vmem [#allocation3], %s3924_s17  ;;  %s4916_s0 = sld [smem:[#allocation26_spill]] }
  0x33   : > { %s357_s21 = sshll.u32 %s346_s27, 4  ;;  %s343_s16 = scalar_lea.sflag [#allocation4], %s342_s18  ;;  %s358_s21 = int_to_ptr.vmem [resolvable:$true] %s357_s21 }
  0x34   : > { %s4421_s19 = smov 6144   ;;  %s4422_s14 = smov 1536  }
  0x35   : > { %s4423_s23 = smov 96   ;;  %s367_s17 = sand.u32 1, %s4411_s10  }
  0x36   : > { %s3925_s27 = smul.u32 1536, %s342_s18  ;;  %s4425_s20 = smov 4  }
  0x37   : > { %s3691_s4 = smul.u32 1536, %s4407_s9  ;;  %s393_s18 = sand.u32 (!%p4514_p3), 1, %s4395_s28  }
  0x38   : > { %s354_s12 = scalar_lea.hbm %s4916_s0, %s3690_s26  ;;  %s371_s25 = scalar_lea.vmem [#allocation6], %s3925_s27 }
  0x39   : > { %s355_s13 = sshll.u32 %s354_s12, 4  ;;  %s376_s7 = scalar_lea.hbm %s4889_s1, %s3691_s4  ;;  %s356_s13 = int_to_ptr.hbm [resolvable:$true] %s355_s13 }
  0x3a   : > { %3982 = dma.hbm_to_vmem [thread:$0]  (!%p4576_p0), %s356_s13, 3072, %s358_s21, %s343_s16, %s4421_s19, %s4422_s14, %s4423_s23  }
  0x3b   : > { %s379_s3 = sshll.u32 %s371_s25, 4  ;;  %s377_s26 = sshll.u32 %s376_s7, 4  ;;  %s380_s3 = int_to_ptr.vmem [resolvable:$true] %s379_s3  ;;  %s378_s26 = int_to_ptr.hbm [resolvable:$true] %s377_s26 }
  0x3c   : > { %s368_s12 = scalar_lea.sflag [#allocation7], %s367_s17  ;;  %s4424_s0 = smov 64  }
  0x3d   : > { %3985 = dma.hbm_to_vmem [thread:$0]  (!%p4576_p0), %s378_s26, 24576, %s380_s3, %s368_s12, %s4424_s0, %s4424_s0, %s4425_s20  }
  0x3e   : > { %391 = sbr.rel (%p4514_p3) target bundleno = 872 (0x368), region = 52  ;;  %s394_s13 = scalar_lea.sflag (!%p4514_p3), [#allocation4], %s393_s18 }
  0x3f   : > { %s3926_s21 = smul.u32 (!%p4514_p3), 192, %s393_s18 }
  0x41   : > { %s4595_s5 = scalar_lea.vmem (!%p4514_p3), [#allocation3], %s3926_s21 }
  0x43   : > { %4362 = dma.done.wait (%p4564_p11), %s394_s13, 3072  }
  0x44   : > { %4364 = vsyncadd (%p4564_p11), %s394_s13, 4294964224  ;;  %s403_s4 = sand.u32 1, %s4506_s11   ;;  %s3927_s6 = smul.u32 1536, %s393_s18 }
  0x45   : > { %s404_s0 = scalar_lea.sflag [#allocation7], %s403_s4 }
  0x46   : > { %s4602_s7 = scalar_lea.vmem [#allocation6], %s3927_s6 }
  0x47   : > { %4366 = dma.done.wait (%p4564_p11), %s404_s0, 24576  }
  0x48   : > { %4368 = vsyncadd (%p4564_p11), %s404_s0, 4294942720 }
  0x49   : > { %4370 = dma.done.wait (%p63_p1), [#allocation7], 2048  }
  0x4a   : > { %4372 = vsyncadd (%p63_p1), [#allocation7], 4294965248 }
  0x4b   : > { %4374 = dma.done.wait (%p63_p1), [#allocation10], 2064  }
  0x4c   : > { %4376 = vsyncadd (%p63_p1), [#allocation10], 4294965232 }
  0x4d   : > { %4378 = dma.done.wait (%p63_p1), [#allocation13], 2064  }
  0x4e   : > { %4380 = vsyncadd (%p63_p1), [#allocation13], 4294965232 }
  0x4f   : > { %4382 = dma.done.wait (%p63_p1), [#allocation16], 16  }
  0x50   : > { %4384 = vsyncadd (%p63_p1), [#allocation16], 4294967280  ;;  %p2820_p2 = scmp.ne.s32.totalorder %s4403_s30, 0 }
  0x52   : > { %478 = sbr.rel (%p2820_p2) target bundleno = 90 (0x5a), region = 88 }
  0x57   : > { %v4426_v0 = vmov 0.0  }
  0x58   : > { %479 = vst [vmem:[#allocation2] sm:$0xff] %v4426_v0 }
  0x59   : > { %480 = vst [vmem:[#allocation2 + $0x8] sm:$0xff] %v4426_v0 }
  0x5a PF: > { %v3723_v1 = vld [vmem:[%s4602_s7 + $0x38] sm:$0xff]  ;;  %v3722_v5 = vld [vmem:[%s4602_s7 + $0x30] sm:$0xff]  ;;  %v3721_v9 = vld [vmem:[%s4602_s7 + $0x28] sm:$0xff]  ;;  %p3685_p1 = scmp.ne.s32.totalorder %s4403_s30, 3 }
  0x5b   : > { %v3731_v2 = vld [vmem:[%s4602_s7 + $0x78] sm:$0xff]  ;;  %2163 = vmatpush.bf16.msra.mxu0 %v3723_v1  ;;  %v3730_v6 = vld [vmem:[%s4602_s7 + $0x70] sm:$0xff]  ;;  %v3729_v10 = vld [vmem:[%s4602_s7 + $0x68] sm:$0xff] }
  0x5c   : > { %v3739_v3 = vld [vmem:[%s4602_s7 + $0xb8] sm:$0xff]  ;;  %2177 = vmatpush.bf16.msra.mxu1 %v3731_v2  ;;  %v3738_v7 = vld [vmem:[%s4602_s7 + $0xb0] sm:$0xff]  ;;  %v3737_v11 = vld [vmem:[%s4602_s7 + $0xa8] sm:$0xff] }
  0x5d   : > { %v3747_v4 = vld [vmem:[%s4602_s7 + $0xf8] sm:$0xff]  ;;  %2191 = vmatpush.bf16.msra.mxu2 %v3739_v3  ;;  %v3746_v8 = vld [vmem:[%s4602_s7 + $0xf0] sm:$0xff]  ;;  %v3745_v12 = vld [vmem:[%s4602_s7 + $0xe8] sm:$0xff] }
  0x5e   : > { %2205 = vmatpush.bf16.msra.mxu3 %v3747_v4  ;;  %v3720_v13 = vld [vmem:[%s4602_s7 + $0x20] sm:$0xff]  ;;  %v3719_v17 = vld [vmem:[%s4602_s7 + $0x18] sm:$0xff]  ;;  %v3718_v21 = vld [vmem:[%s4602_s7 + $0x10] sm:$0xff] }
  0x5f   : > { %2164 = vmatpush.bf16.msra.mxu0 %v3722_v5  ;;  %v3728_v14 = vld [vmem:[%s4602_s7 + $0x60] sm:$0xff]  ;;  %v3727_v18 = vld [vmem:[%s4602_s7 + $0x58] sm:$0xff]  ;;  %v3726_v22 = vld [vmem:[%s4602_s7 + $0x50] sm:$0xff] }
  0x60   : > { %2178 = vmatpush.bf16.msra.mxu1 %v3730_v6  ;;  %v3736_v15 = vld [vmem:[%s4602_s7 + $0xa0] sm:$0xff]  ;;  %v3735_v19 = vld [vmem:[%s4602_s7 + $0x98] sm:$0xff]  ;;  %v3734_v23 = vld [vmem:[%s4602_s7 + $0x90] sm:$0xff] }
  0x61   : > { %2192 = vmatpush.bf16.msra.mxu2 %v3738_v7  ;;  %v3744_v16 = vld [vmem:[%s4602_s7 + $0xe0] sm:$0xff]  ;;  %v3743_v20 = vld [vmem:[%s4602_s7 + $0xd8] sm:$0xff]  ;;  %v3742_v24 = vld [vmem:[%s4602_s7 + $0xd0] sm:$0xff] }
  0x62   : > { %2206 = vmatpush.bf16.msra.mxu3 %v3746_v8  ;;  %v3717_v25 = vld [vmem:[%s4602_s7 + $0x8] sm:$0xff]  ;;  %v3716_v29 = vld [vmem:[%s4602_s7] sm:$0xff]  ;;  %v3755_v33 = vld [vmem:[%s4602_s7 + $0x138] sm:$0xff] }
  0x63   : > { %2165 = vmatpush.bf16.msra.mxu0 %v3721_v9  ;;  %v3725_v26 = vld [vmem:[%s4602_s7 + $0x48] sm:$0xff]  ;;  %v3724_v30 = vld [vmem:[%s4602_s7 + $0x40] sm:$0xff]  ;;  %v3763_v34 = vld [vmem:[%s4602_s7 + $0x178] sm:$0xff] }
  0x64   : > { %2179 = vmatpush.bf16.msra.mxu1 %v3729_v10  ;;  %v3733_v27 = vld [vmem:[%s4602_s7 + $0x88] sm:$0xff]  ;;  %v3732_v31 = vld [vmem:[%s4602_s7 + $0x80] sm:$0xff]  ;;  %v3771_v43 = vld [vmem:[%s4602_s7 + $0x1b8] sm:$0xff] }
  0x65   : > { %2193 = vmatpush.bf16.msra.mxu2 %v3737_v11  ;;  %v3741_v28 = vld [vmem:[%s4602_s7 + $0xc8] sm:$0xff]  ;;  %v3740_v32 = vld [vmem:[%s4602_s7 + $0xc0] sm:$0xff]  ;;  %v3779_v44 = vld [vmem:[%s4602_s7 + $0x1f8] sm:$0xff] }
  0x66   : > { %2207 = vmatpush.bf16.msra.mxu3 %v3745_v12  ;;  %v2823_v35 = vld [vmem:[%s4595_s5] sm:$0xf]  ;;  %v2831_v37 = vld [vmem:[%s4595_s5 + $0x8] sm:$0xf]  ;;  %v3692_v39 = vld [vmem:[%s4595_s5 + $0x4] sm:$0xf] }
  0x67   : > { %2166 = vmatpush.bf16.msra.mxu0 %v3720_v13  ;;  %v3704_v36 = vld [vmem:[%s4595_s5 + $0x5c] sm:$0xf0]  ;;  %v3705_v38 = vld [vmem:[%s4595_s5 + $0x64] sm:$0xf0]  ;;  %v2825_v40 = vld [vmem:[%s4595_s5 + $0x60] sm:$0xf0] }
  0x68   : > { %2180 = vmatpush.bf16.msra.mxu1 %v3728_v14  ;;  %v3693_v41 = vld [vmem:[%s4595_s5 + $0xc] sm:$0xf]  ;;  %v2824_v45 = vor.u32 %v3704_v36, %v2823_v35  ;;  %v2832_v46 = vor.u32 %v3705_v38, %v2831_v37  ;;  %v2828_v47 = vor.u32 %v3692_v39, %v2825_v40  ;;  %v3754_v49 = vld [vmem:[%s4602_s7 + $0x130] sm:$0xff]  ;;  %v3752_v57 = vld [vmem:[%s4602_s7 + $0x120] sm:$0xff] }
  0x69   : > { %2194 = vmatpush.bf16.msra.mxu2 %v3736_v15  ;;  %v2833_v42 = vld [vmem:[%s4595_s5 + $0x68] sm:$0xf0]  ;;  %v3762_v50 = vld [vmem:[%s4602_s7 + $0x170] sm:$0xff]  ;;  %v3760_v58 = vld [vmem:[%s4602_s7 + $0x160] sm:$0xff] }
  0x6a   : > { %2208 = vmatpush.bf16.msra.mxu3 %v3744_v16  ;;  %v2836_v48 = vor.u32 %v3693_v41, %v2833_v42  ;;  %v3770_v51 = vld [vmem:[%s4602_s7 + $0x1b0] sm:$0xff]  ;;  %v3753_v53 = vld [vmem:[%s4602_s7 + $0x128] sm:$0xff]  ;;  %v3768_v59 = vld [vmem:[%s4602_s7 + $0x1a0] sm:$0xff] }
  0x6b   : > { %2167 = vmatpush.bf16.msra.mxu0 %v3719_v17  ;;  %v3778_v52 = vld [vmem:[%s4602_s7 + $0x1f0] sm:$0xff]  ;;  %v3761_v54 = vld [vmem:[%s4602_s7 + $0x168] sm:$0xff]  ;;  %v3776_v60 = vld [vmem:[%s4602_s7 + $0x1e0] sm:$0xff] }
  0x6c   : > { %2181 = vmatpush.bf16.msra.mxu1 %v3727_v18  ;;  %v3769_v55 = vld [vmem:[%s4602_s7 + $0x1a8] sm:$0xff]  ;;  %v3751_v61 = vld [vmem:[%s4602_s7 + $0x118] sm:$0xff]  ;;  %v3750_v1 = vld [vmem:[%s4602_s7 + $0x110] sm:$0xff] }
  0x6d   : > { %2195 = vmatpush.bf16.msra.mxu2 %v3735_v19  ;;  %v3777_v56 = vld [vmem:[%s4602_s7 + $0x1e8] sm:$0xff]  ;;  %v3759_v62 = vld [vmem:[%s4602_s7 + $0x158] sm:$0xff]  ;;  %v3758_v2 = vld [vmem:[%s4602_s7 + $0x150] sm:$0xff] }
  0x6e   : > { %2209 = vmatpush.bf16.msra.mxu3 %v3743_v20  ;;  %v3767_v63 = vld [vmem:[%s4602_s7 + $0x198] sm:$0xff]  ;;  %v3766_v3 = vld [vmem:[%s4602_s7 + $0x190] sm:$0xff]  ;;  %v3749_v5 = vld [vmem:[%s4602_s7 + $0x108] sm:$0xff] }
  0x6f   : > { %2168 = vmatpush.bf16.msra.mxu0 %v3718_v21  ;;  %v3775_v0 = vld [vmem:[%s4602_s7 + $0x1d8] sm:$0xff]  ;;  %v3774_v4 = vld [vmem:[%s4602_s7 + $0x1d0] sm:$0xff]  ;;  %v3757_v6 = vld [vmem:[%s4602_s7 + $0x148] sm:$0xff] }
  0x70   : > { %2182 = vmatpush.bf16.msra.mxu1 %v3726_v22  ;;  %v3765_v7 = vld [vmem:[%s4602_s7 + $0x188] sm:$0xff]  ;;  %v3748_v9 = vld [vmem:[%s4602_s7 + $0x100] sm:$0xff]  ;;  %v3787_v13 = vld [vmem:[%s4602_s7 + $0x238] sm:$0xff] }
  0x71   : > { %2196 = vmatpush.bf16.msra.mxu2 %v3734_v23  ;;  %v3773_v8 = vld [vmem:[%s4602_s7 + $0x1c8] sm:$0xff]  ;;  %v3756_v10 = vld [vmem:[%s4602_s7 + $0x140] sm:$0xff]  ;;  %v3795_v14 = vld [vmem:[%s4602_s7 + $0x278] sm:$0xff] }
  0x72   : > { %2210 = vmatpush.bf16.msra.mxu3 %v3742_v24  ;;  %v3764_v11 = vld [vmem:[%s4602_s7 + $0x180] sm:$0xff]  ;;  %v2839_v15 = vld [vmem:[%s4595_s5 + $0x10] sm:$0xf]  ;;  %v2847_v17 = vld [vmem:[%s4595_s5 + $0x18] sm:$0xf] }
  0x73   : > { %2169 = vmatpush.bf16.msra.mxu0 %v3717_v25  ;;  %v3772_v12 = vld [vmem:[%s4602_s7 + $0x1c0] sm:$0xff]  ;;  %v3706_v16 = vld [vmem:[%s4595_s5 + $0x6c] sm:$0xf0]  ;;  %v3707_v18 = vld [vmem:[%s4595_s5 + $0x74] sm:$0xf0] }
  0x74   : > { %2183 = vmatpush.bf16.msra.mxu1 %v3725_v26  ;;  %v3694_v19 = vld [vmem:[%s4595_s5 + $0x14] sm:$0xf]  ;;  %v3695_v21 = vld [vmem:[%s4595_s5 + $0x1c] sm:$0xf]  ;;  %v2840_v25 = vor.u32 %v3706_v16, %v2839_v15  ;;  %v2848_v26 = vor.u32 %v3707_v18, %v2847_v17  ;;  %v3801_v35 = vld [vmem:[%s4602_s7 + $0x2a8] sm:$0xff] }
  0x75   : > { %2197 = vmatpush.bf16.msra.mxu2 %v3733_v27  ;;  %v2841_v20 = vld [vmem:[%s4595_s5 + $0x70] sm:$0xf0]  ;;  %v2849_v22 = vld [vmem:[%s4595_s5 + $0x78] sm:$0xf0]  ;;  %v3809_v36 = vld [vmem:[%s4602_s7 + $0x2e8] sm:$0xff] }
  0x76   : > { %2211 = vmatpush.bf16.msra.mxu3 %v3741_v28  ;;  %v3803_v23 = vld [vmem:[%s4602_s7 + $0x2b8] sm:$0xff]  ;;  %v2844_v27 = vor.u32 %v3694_v19, %v2841_v20  ;;  %v2852_v28 = vor.u32 %v3695_v21, %v2849_v22  ;;  %v3784_v37 = vld [vmem:[%s4602_s7 + $0x220] sm:$0xff]  ;;  %v3833_v15 = vld [vmem:[%s4602_s7 + $0x3a8] sm:$0xff] }
  0x77   : > { %2170 = vmatpush.bf16.msra.mxu0 %v3716_v29  ;;  %v3811_v24 = vld [vmem:[%s4602_s7 + $0x2f8] sm:$0xff]  ;;  %v3786_v29 = vld [vmem:[%s4602_s7 + $0x230] sm:$0xff]  ;;  %v3792_v38 = vld [vmem:[%s4602_s7 + $0x260] sm:$0xff] }
  0x78   : > { %2184 = vmatpush.bf16.msra.mxu1 %v3724_v30  ;;  %v3794_v30 = vld [vmem:[%s4602_s7 + $0x270] sm:$0xff]  ;;  %v3800_v39 = vld [vmem:[%s4602_s7 + $0x2a0] sm:$0xff]  ;;  %v3783_v41 = vld [vmem:[%s4602_s7 + $0x218] sm:$0xff] }
  0x79   : > { %2198 = vmatpush.bf16.msra.mxu2 %v3732_v31  ;;  %v3802_v31 = vld [vmem:[%s4602_s7 + $0x2b0] sm:$0xff]  ;;  %v3808_v40 = vld [vmem:[%s4602_s7 + $0x2e0] sm:$0xff]  ;;  %v3791_v42 = vld [vmem:[%s4602_s7 + $0x258] sm:$0xff] }
  0x7a   : > { %2212 = vmatpush.bf16.msra.mxu3 %v3740_v32  ;;  %2171 = vmatmul.bf16.vlgmr.msra.gmra.mxu0 %v2824_v45  ;;  %v3810_v32 = vld [vmem:[%s4602_s7 + $0x2f0] sm:$0xff]  ;;  %v3841_v16 = vld [vmem:[%s4602_s7 + $0x3e8] sm:$0xff]  ;;  %v3816_v17 = vld [vmem:[%s4602_s7 + $0x320] sm:$0xff] }
  0x7b   : > { %2219 = vmatpush.bf16.msrb.mxu0 %v3755_v33  ;;  %2185 = vmatmul.bf16.vlgmr.msra.gmra.mxu1 %v2828_v47  ;;  %v3785_v33 = vld [vmem:[%s4602_s7 + $0x228] sm:$0xff]  ;;  %v3782_v45 = vld [vmem:[%s4602_s7 + $0x210] sm:$0xff]  ;;  %v3824_v18 = vld [vmem:[%s4602_s7 + $0x360] sm:$0xff] }
  0x7c   : > { %2233 = vmatpush.bf16.msrb.mxu1 %v3763_v34  ;;  %2199 = vmatmul.bf16.vlgmr.msra.gmra.mxu2 %v2832_v46  ;;  %v3793_v34 = vld [vmem:[%s4602_s7 + $0x268] sm:$0xff]  ;;  %v3790_v46 = vld [vmem:[%s4602_s7 + $0x250] sm:$0xff]  ;;  %v3832_v19 = vld [vmem:[%s4602_s7 + $0x3a0] sm:$0xff] }
  0x7d   : > { %2247 = vmatpush.bf16.msrb.mxu2 %v3771_v43  ;;  %2213 = vmatmul.bf16.vlgmr.msra.gmra.mxu3 %v2836_v48  ;;  %v3799_v43 = vld [vmem:[%s4602_s7 + $0x298] sm:$0xff]  ;;  %v3798_v47 = vld [vmem:[%s4602_s7 + $0x290] sm:$0xff]  ;;  %v3840_v20 = vld [vmem:[%s4602_s7 + $0x3e0] sm:$0xff] }
  0x7e   : > { %2261 = vmatpush.bf16.msrb.mxu3 %v3779_v44  ;;  %v3807_v44 = vld [vmem:[%s4602_s7 + $0x2d8] sm:$0xff]  ;;  %v3806_v48 = vld [vmem:[%s4602_s7 + $0x2d0] sm:$0xff] }
  0x7f   : > { %2220 = vmatpush.bf16.msrb.mxu0 %v3754_v49  ;;  %v3781_v49 = vld [vmem:[%s4602_s7 + $0x208] sm:$0xff]  ;;  %v3815_v21 = vld [vmem:[%s4602_s7 + $0x318] sm:$0xff] }
  0x80   : > { %2234 = vmatpush.bf16.msrb.mxu1 %v3762_v50  ;;  %v3789_v50 = vld [vmem:[%s4602_s7 + $0x248] sm:$0xff]  ;;  %v3823_v22 = vld [vmem:[%s4602_s7 + $0x358] sm:$0xff] }
  0x81   : > { %2248 = vmatpush.bf16.msrb.mxu2 %v3770_v51  ;;  %v3797_v51 = vld [vmem:[%s4602_s7 + $0x288] sm:$0xff] }
  0x82   : > { %2262 = vmatpush.bf16.msrb.mxu3 %v3778_v52  ;;  %v3805_v52 = vld [vmem:[%s4602_s7 + $0x2c8] sm:$0xff] }
  0x83   : > { %2221 = vmatpush.bf16.msrb.mxu0 %v3753_v53  ;;  %v3780_v53 = vld [vmem:[%s4602_s7 + $0x200] sm:$0xff] }
  0x84   : > { %2235 = vmatpush.bf16.msrb.mxu1 %v3761_v54  ;;  %v3788_v54 = vld [vmem:[%s4602_s7 + $0x240] sm:$0xff] }
  0x85   : > { %2249 = vmatpush.bf16.msrb.mxu2 %v3769_v55  ;;  %v3796_v55 = vld [vmem:[%s4602_s7 + $0x280] sm:$0xff] }
  0x86   : > { %2263 = vmatpush.bf16.msrb.mxu3 %v3777_v56  ;;  %v3804_v56 = vld [vmem:[%s4602_s7 + $0x2c0] sm:$0xff] }
  0x87   : > { %2222 = vmatpush.bf16.msrb.mxu0 %v3752_v57  ;;  %v3819_v57 = vld [vmem:[%s4602_s7 + $0x338] sm:$0xff] }
  0x88   : > { %2236 = vmatpush.bf16.msrb.mxu1 %v3760_v58  ;;  %v3827_v58 = vld [vmem:[%s4602_s7 + $0x378] sm:$0xff] }
  0x89   : > { %2250 = vmatpush.bf16.msrb.mxu2 %v3768_v59  ;;  %v2855_v59 = vld [vmem:[%s4595_s5 + $0x20] sm:$0xf] }
  0x8a   : > { %2264 = vmatpush.bf16.msrb.mxu3 %v3776_v60  ;;  %v3708_v60 = vld [vmem:[%s4595_s5 + $0x7c] sm:$0xf0] }
  0x8b   : > { %2223 = vmatpush.bf16.msrb.mxu0 %v3751_v61  ;;  %v2863_v61 = vld [vmem:[%s4595_s5 + $0x28] sm:$0xf] }
  0x8c   : > { %2237 = vmatpush.bf16.msrb.mxu1 %v3759_v62  ;;  %v3709_v62 = vld [vmem:[%s4595_s5 + $0x84] sm:$0xf0] }
  0x8d   : > { %2251 = vmatpush.bf16.msrb.mxu2 %v3767_v63  ;;  %v3696_v63 = vld [vmem:[%s4595_s5 + $0x24] sm:$0xf] }
  0x8e   : > { %2265 = vmatpush.bf16.msrb.mxu3 %v3775_v0  ;;  %v2857_v0 = vld [vmem:[%s4595_s5 + $0x80] sm:$0xf0] }
  0x8f   : > { %2224 = vmatpush.bf16.msrb.mxu0 %v3750_v1  ;;  %v3697_v1 = vld [vmem:[%s4595_s5 + $0x2c] sm:$0xf] }
  0x90   : > { %2238 = vmatpush.bf16.msrb.mxu1 %v3758_v2  ;;  %v2865_v2 = vld [vmem:[%s4595_s5 + $0x88] sm:$0xf0] }
  0x91   : > { %2252 = vmatpush.bf16.msrb.mxu2 %v3766_v3  ;;  %v3835_v3 = vld [vmem:[%s4602_s7 + $0x3b8] sm:$0xff] }
  0x92   : > { %2266 = vmatpush.bf16.msrb.mxu3 %v3774_v4  ;;  %v3843_v4 = vld [vmem:[%s4602_s7 + $0x3f8] sm:$0xff] }
  0x93   : > { %2225 = vmatpush.bf16.msrb.mxu0 %v3749_v5  ;;  %v2856_v5 = vor.u32 %v3708_v60, %v2855_v59  ;;  %v3865_v59 = vld [vmem:[%s4602_s7 + $0x4a8] sm:$0xff] }
  0x94   : > { %2239 = vmatpush.bf16.msrb.mxu1 %v3757_v6  ;;  %v2864_v6 = vor.u32 %v3709_v62, %v2863_v61  ;;  %v3873_v60 = vld [vmem:[%s4602_s7 + $0x4e8] sm:$0xff]  ;;  %v3848_v61 = vld [vmem:[%s4602_s7 + $0x420] sm:$0xff] }
  0x95   : > { %2253 = vmatpush.bf16.msrb.mxu2 %v3765_v7  ;;  %v2860_v7 = vor.u32 %v3696_v63, %v2857_v0  ;;  %v3856_v62 = vld [vmem:[%s4602_s7 + $0x460] sm:$0xff] }
  0x96   : > { %2267 = vmatpush.bf16.msrb.mxu3 %v3773_v8  ;;  %v2868_v8 = vor.u32 %v3697_v1, %v2865_v2  ;;  %v3864_v63 = vld [vmem:[%s4602_s7 + $0x4a0] sm:$0xff]  ;;  %v3847_v1 = vld [vmem:[%s4602_s7 + $0x418] sm:$0xff] }
  0x97   : > { %2226 = vmatpush.bf16.msrb.mxu0 %v3748_v9  ;;  %v3818_v9 = vld [vmem:[%s4602_s7 + $0x330] sm:$0xff]  ;;  %v3872_v0 = vld [vmem:[%s4602_s7 + $0x4e0] sm:$0xff]  ;;  %v3855_v2 = vld [vmem:[%s4602_s7 + $0x458] sm:$0xff] }
  0x98   : > { %2240 = vmatpush.bf16.msrb.mxu1 %v3756_v10  ;;  %v3826_v10 = vld [vmem:[%s4602_s7 + $0x370] sm:$0xff] }
  0x99   : > { %2254 = vmatpush.bf16.msrb.mxu2 %v3764_v11  ;;  %v3834_v11 = vld [vmem:[%s4602_s7 + $0x3b0] sm:$0xff] }
  0x9a   : > { %2268 = vmatpush.bf16.msrb.mxu3 %v3772_v12  ;;  %2227 = vmatmul.bf16.vlgmr.msrb.gmra.mxu0 %v2840_v25  ;;  %v3842_v12 = vld [vmem:[%s4602_s7 + $0x3f0] sm:$0xff] }
  0x9b   : > { %2275 = vmatpush.bf16.msra.mxu0 %v3787_v13  ;;  %2241 = vmatmul.bf16.vlgmr.msrb.gmra.mxu1 %v2844_v27  ;;  %v3817_v13 = vld [vmem:[%s4602_s7 + $0x328] sm:$0xff]  ;;  %v3814_v25 = vld [vmem:[%s4602_s7 + $0x310] sm:$0xff] }
  0x9c   : > { %2289 = vmatpush.bf16.msra.mxu1 %v3795_v14  ;;  %2255 = vmatmul.bf16.vlgmr.msrb.gmra.mxu2 %v2848_v26  ;;  %v3825_v14 = vld [vmem:[%s4602_s7 + $0x368] sm:$0xff]  ;;  %v3822_v26 = vld [vmem:[%s4602_s7 + $0x350] sm:$0xff] }
  0x9d   : > { %2303 = vmatpush.bf16.msra.mxu2 %v3803_v23  ;;  %2269 = vmatmul.bf16.vlgmr.msrb.gmra.mxu3 %v2852_v28  ;;  %v3831_v23 = vld [vmem:[%s4602_s7 + $0x398] sm:$0xff]  ;;  %v3830_v27 = vld [vmem:[%s4602_s7 + $0x390] sm:$0xff] }
  0x9e   : > { %2317 = vmatpush.bf16.msra.mxu3 %v3811_v24  ;;  %v3839_v24 = vld [vmem:[%s4602_s7 + $0x3d8] sm:$0xff]  ;;  %v3838_v28 = vld [vmem:[%s4602_s7 + $0x3d0] sm:$0xff] }
  0x9f   : > { %2276 = vmatpush.bf16.msra.mxu0 %v3786_v29  ;;  %v3813_v29 = vld [vmem:[%s4602_s7 + $0x308] sm:$0xff] }
  0xa0   : > { %2290 = vmatpush.bf16.msra.mxu1 %v3794_v30  ;;  %v3821_v30 = vld [vmem:[%s4602_s7 + $0x348] sm:$0xff] }
  0xa1   : > { %2304 = vmatpush.bf16.msra.mxu2 %v3802_v31  ;;  %v3829_v31 = vld [vmem:[%s4602_s7 + $0x388] sm:$0xff] }
  0xa2   : > { %2318 = vmatpush.bf16.msra.mxu3 %v3810_v32  ;;  %v3837_v32 = vld [vmem:[%s4602_s7 + $0x3c8] sm:$0xff] }
  0xa3   : > { %2277 = vmatpush.bf16.msra.mxu0 %v3785_v33  ;;  %v3812_v33 = vld [vmem:[%s4602_s7 + $0x300] sm:$0xff] }
  0xa4   : > { %2291 = vmatpush.bf16.msra.mxu1 %v3793_v34  ;;  %v3820_v34 = vld [vmem:[%s4602_s7 + $0x340] sm:$0xff] }
  0xa5   : > { %2305 = vmatpush.bf16.msra.mxu2 %v3801_v35  ;;  %v3828_v35 = vld [vmem:[%s4602_s7 + $0x380] sm:$0xff] }
  0xa6   : > { %2319 = vmatpush.bf16.msra.mxu3 %v3809_v36  ;;  %v3836_v36 = vld [vmem:[%s4602_s7 + $0x3c0] sm:$0xff] }
  0xa7   : > { %2278 = vmatpush.bf16.msra.mxu0 %v3784_v37  ;;  %v3851_v37 = vld [vmem:[%s4602_s7 + $0x438] sm:$0xff] }
  0xa8   : > { %2292 = vmatpush.bf16.msra.mxu1 %v3792_v38  ;;  %v3859_v38 = vld [vmem:[%s4602_s7 + $0x478] sm:$0xff] }
  0xa9   : > { %2306 = vmatpush.bf16.msra.mxu2 %v3800_v39  ;;  %v2871_v39 = vld [vmem:[%s4595_s5 + $0x30] sm:$0xf] }
  0xaa   : > { %2320 = vmatpush.bf16.msra.mxu3 %v3808_v40  ;;  %v3710_v40 = vld [vmem:[%s4595_s5 + $0x8c] sm:$0xf0] }
  0xab   : > { %2279 = vmatpush.bf16.msra.mxu0 %v3783_v41  ;;  %v2879_v41 = vld [vmem:[%s4595_s5 + $0x38] sm:$0xf] }
  0xac   : > { %2293 = vmatpush.bf16.msra.mxu1 %v3791_v42  ;;  %v3711_v42 = vld [vmem:[%s4595_s5 + $0x94] sm:$0xf0] }
  0xad   : > { %2307 = vmatpush.bf16.msra.mxu2 %v3799_v43  ;;  %v3698_v43 = vld [vmem:[%s4595_s5 + $0x34] sm:$0xf] }
  0xae   : > { %2321 = vmatpush.bf16.msra.mxu3 %v3807_v44  ;;  %v2873_v44 = vld [vmem:[%s4595_s5 + $0x90] sm:$0xf0] }
  0xaf   : > { %2280 = vmatpush.bf16.msra.mxu0 %v3782_v45  ;;  %v3699_v45 = vld [vmem:[%s4595_s5 + $0x3c] sm:$0xf] }
  0xb0   : > { %2294 = vmatpush.bf16.msra.mxu1 %v3790_v46  ;;  %v2881_v46 = vld [vmem:[%s4595_s5 + $0x98] sm:$0xf0] }
  0xb1   : > { %2308 = vmatpush.bf16.msra.mxu2 %v3798_v47  ;;  %v3867_v47 = vld [vmem:[%s4602_s7 + $0x4b8] sm:$0xff] }
  0xb2   : > { %2322 = vmatpush.bf16.msra.mxu3 %v3806_v48  ;;  %v3875_v48 = vld [vmem:[%s4602_s7 + $0x4f8] sm:$0xff] }
  0xb3   : > { %2281 = vmatpush.bf16.msra.mxu0 %v3781_v49  ;;  %v2872_v49 = vor.u32 %v3710_v40, %v2871_v39  ;;  %v3897_v39 = vld [vmem:[%s4602_s7 + $0x5a8] sm:$0xff] }
  0xb4   : > { %2295 = vmatpush.bf16.msra.mxu1 %v3789_v50  ;;  %v2880_v50 = vor.u32 %v3711_v42, %v2879_v41  ;;  %v3905_v40 = vld [vmem:[%s4602_s7 + $0x5e8] sm:$0xff]  ;;  %v3880_v41 = vld [vmem:[%s4602_s7 + $0x520] sm:$0xff] }
  0xb5   : > { %2309 = vmatpush.bf16.msra.mxu2 %v3797_v51  ;;  %v2876_v51 = vor.u32 %v3698_v43, %v2873_v44  ;;  %v3888_v42 = vld [vmem:[%s4602_s7 + $0x560] sm:$0xff] }
  0xb6   : > { %2323 = vmatpush.bf16.msra.mxu3 %v3805_v52  ;;  %v2884_v52 = vor.u32 %v3699_v45, %v2881_v46  ;;  %v3896_v43 = vld [vmem:[%s4602_s7 + $0x5a0] sm:$0xff]  ;;  %v3879_v45 = vld [vmem:[%s4602_s7 + $0x518] sm:$0xff] }
  0xb7   : > { %2282 = vmatpush.bf16.msra.mxu0 %v3780_v53  ;;  %v3850_v53 = vld [vmem:[%s4602_s7 + $0x430] sm:$0xff]  ;;  %v3904_v44 = vld [vmem:[%s4602_s7 + $0x5e0] sm:$0xff]  ;;  %v3887_v46 = vld [vmem:[%s4602_s7 + $0x558] sm:$0xff] }
  0xb8   : > { %2296 = vmatpush.bf16.msra.mxu1 %v3788_v54  ;;  %v3858_v54 = vld [vmem:[%s4602_s7 + $0x470] sm:$0xff] }
  0xb9   : > { %2310 = vmatpush.bf16.msra.mxu2 %v3796_v55  ;;  %v3866_v55 = vld [vmem:[%s4602_s7 + $0x4b0] sm:$0xff] }
  0xba   : > { %2324 = vmatpush.bf16.msra.mxu3 %v3804_v56  ;;  %2283 = vmatmul.bf16.vlgmr.msra.gmra.mxu0 %v2856_v5  ;;  %v3874_v56 = vld [vmem:[%s4602_s7 + $0x4f0] sm:$0xff] }
  0xbb   : > { %2331 = vmatpush.bf16.msrb.mxu0 %v3819_v57  ;;  %2297 = vmatmul.bf16.vlgmr.msra.gmra.mxu1 %v2860_v7  ;;  %v3849_v57 = vld [vmem:[%s4602_s7 + $0x428] sm:$0xff]  ;;  %v3846_v5 = vld [vmem:[%s4602_s7 + $0x410] sm:$0xff] }
  0xbc   : > { %2345 = vmatpush.bf16.msrb.mxu1 %v3827_v58  ;;  %2311 = vmatmul.bf16.vlgmr.msra.gmra.mxu2 %v2864_v6  ;;  %v3857_v58 = vld [vmem:[%s4602_s7 + $0x468] sm:$0xff]  ;;  %v3854_v6 = vld [vmem:[%s4602_s7 + $0x450] sm:$0xff] }
  0xbd   : > { %2359 = vmatpush.bf16.msrb.mxu2 %v3835_v3  ;;  %2325 = vmatmul.bf16.vlgmr.msra.gmra.mxu3 %v2868_v8  ;;  %v3863_v3 = vld [vmem:[%s4602_s7 + $0x498] sm:$0xff]  ;;  %v3862_v7 = vld [vmem:[%s4602_s7 + $0x490] sm:$0xff] }
  0xbe   : > { %2373 = vmatpush.bf16.msrb.mxu3 %v3843_v4  ;;  %v3871_v4 = vld [vmem:[%s4602_s7 + $0x4d8] sm:$0xff]  ;;  %v3870_v8 = vld [vmem:[%s4602_s7 + $0x4d0] sm:$0xff] }
  0xbf   : > { %2332 = vmatpush.bf16.msrb.mxu0 %v3818_v9  ;;  %v3845_v9 = vld [vmem:[%s4602_s7 + $0x408] sm:$0xff] }
  0xc0   : > { %2346 = vmatpush.bf16.msrb.mxu1 %v3826_v10  ;;  %v3853_v10 = vld [vmem:[%s4602_s7 + $0x448] sm:$0xff] }
  0xc1   : > { %2360 = vmatpush.bf16.msrb.mxu2 %v3834_v11  ;;  %v3861_v11 = vld [vmem:[%s4602_s7 + $0x488] sm:$0xff] }
  0xc2   : > { %2374 = vmatpush.bf16.msrb.mxu3 %v3842_v12  ;;  %v3869_v12 = vld [vmem:[%s4602_s7 + $0x4c8] sm:$0xff] }
  0xc3   : > { %2333 = vmatpush.bf16.msrb.mxu0 %v3817_v13  ;;  %v3844_v13 = vld [vmem:[%s4602_s7 + $0x400] sm:$0xff] }
  0xc4   : > { %2347 = vmatpush.bf16.msrb.mxu1 %v3825_v14  ;;  %v3852_v14 = vld [vmem:[%s4602_s7 + $0x440] sm:$0xff] }
  0xc5   : > { %2361 = vmatpush.bf16.msrb.mxu2 %v3833_v15  ;;  %v3860_v15 = vld [vmem:[%s4602_s7 + $0x480] sm:$0xff] }
  0xc6   : > { %2375 = vmatpush.bf16.msrb.mxu3 %v3841_v16  ;;  %v3868_v16 = vld [vmem:[%s4602_s7 + $0x4c0] sm:$0xff] }
  0xc7   : > { %2334 = vmatpush.bf16.msrb.mxu0 %v3816_v17  ;;  %v3883_v17 = vld [vmem:[%s4602_s7 + $0x538] sm:$0xff] }
  0xc8   : > { %2348 = vmatpush.bf16.msrb.mxu1 %v3824_v18  ;;  %v3891_v18 = vld [vmem:[%s4602_s7 + $0x578] sm:$0xff] }
  0xc9   : > { %2362 = vmatpush.bf16.msrb.mxu2 %v3832_v19  ;;  %v2887_v19 = vld [vmem:[%s4595_s5 + $0x40] sm:$0xf] }
  0xca   : > { %2376 = vmatpush.bf16.msrb.mxu3 %v3840_v20  ;;  %v3712_v20 = vld [vmem:[%s4595_s5 + $0x9c] sm:$0xf0] }
  0xcb   : > { %2335 = vmatpush.bf16.msrb.mxu0 %v3815_v21  ;;  %v2895_v21 = vld [vmem:[%s4595_s5 + $0x48] sm:$0xf] }
  0xcc   : > { %2349 = vmatpush.bf16.msrb.mxu1 %v3823_v22  ;;  %v3713_v22 = vld [vmem:[%s4595_s5 + $0xa4] sm:$0xf0] }
  0xcd   : > { %2363 = vmatpush.bf16.msrb.mxu2 %v3831_v23  ;;  %v3700_v23 = vld [vmem:[%s4595_s5 + $0x44] sm:$0xf] }
  0xce   : > { %2377 = vmatpush.bf16.msrb.mxu3 %v3839_v24  ;;  %v2889_v24 = vld [vmem:[%s4595_s5 + $0xa0] sm:$0xf0] }
  0xcf   : > { %2336 = vmatpush.bf16.msrb.mxu0 %v3814_v25  ;;  %v3701_v25 = vld [vmem:[%s4595_s5 + $0x4c] sm:$0xf] }
  0xd0   : > { %2350 = vmatpush.bf16.msrb.mxu1 %v3822_v26  ;;  %v2897_v26 = vld [vmem:[%s4595_s5 + $0xa8] sm:$0xf0] }
  0xd1   : > { %2364 = vmatpush.bf16.msrb.mxu2 %v3830_v27  ;;  %v3899_v27 = vld [vmem:[%s4602_s7 + $0x5b8] sm:$0xff] }
  0xd2   : > { %2378 = vmatpush.bf16.msrb.mxu3 %v3838_v28  ;;  %v3907_v28 = vld [vmem:[%s4602_s7 + $0x5f8] sm:$0xff] }
  0xd3   : > { %2337 = vmatpush.bf16.msrb.mxu0 %v3813_v29  ;;  %v2888_v29 = vor.u32 %v3712_v20, %v2887_v19 }
  0xd4   : > { %2351 = vmatpush.bf16.msrb.mxu1 %v3821_v30  ;;  %v2896_v30 = vor.u32 %v3713_v22, %v2895_v21 }
  0xd5   : > { %2365 = vmatpush.bf16.msrb.mxu2 %v3829_v31  ;;  %v2892_v31 = vor.u32 %v3700_v23, %v2889_v24 }
  0xd6   : > { %2379 = vmatpush.bf16.msrb.mxu3 %v3837_v32  ;;  %v2900_v32 = vor.u32 %v3701_v25, %v2897_v26 }
  0xd7   : > { %2338 = vmatpush.bf16.msrb.mxu0 %v3812_v33  ;;  %v3882_v33 = vld [vmem:[%s4602_s7 + $0x530] sm:$0xff] }
  0xd8   : > { %2352 = vmatpush.bf16.msrb.mxu1 %v3820_v34  ;;  %v3890_v34 = vld [vmem:[%s4602_s7 + $0x570] sm:$0xff] }
  0xd9   : > { %2366 = vmatpush.bf16.msrb.mxu2 %v3828_v35  ;;  %v3898_v35 = vld [vmem:[%s4602_s7 + $0x5b0] sm:$0xff] }
  0xda   : > { %2380 = vmatpush.bf16.msrb.mxu3 %v3836_v36  ;;  %2339 = vmatmul.bf16.vlgmr.msrb.gmra.mxu0 %v2872_v49  ;;  %v3906_v36 = vld [vmem:[%s4602_s7 + $0x5f0] sm:$0xff] }
  0xdb   : > { %2387 = vmatpush.bf16.msra.mxu0 %v3851_v37  ;;  %2353 = vmatmul.bf16.vlgmr.msrb.gmra.mxu1 %v2876_v51  ;;  %v3881_v37 = vld [vmem:[%s4602_s7 + $0x528] sm:$0xff]  ;;  %v3878_v49 = vld [vmem:[%s4602_s7 + $0x510] sm:$0xff] }
  0xdc   : > { %2401 = vmatpush.bf16.msra.mxu1 %v3859_v38  ;;  %2367 = vmatmul.bf16.vlgmr.msrb.gmra.mxu2 %v2880_v50  ;;  %v3889_v38 = vld [vmem:[%s4602_s7 + $0x568] sm:$0xff]  ;;  %v3886_v50 = vld [vmem:[%s4602_s7 + $0x550] sm:$0xff] }
  0xdd   : > { %2415 = vmatpush.bf16.msra.mxu2 %v3867_v47  ;;  %2381 = vmatmul.bf16.vlgmr.msrb.gmra.mxu3 %v2884_v52  ;;  %v3895_v47 = vld [vmem:[%s4602_s7 + $0x598] sm:$0xff]  ;;  %v3894_v51 = vld [vmem:[%s4602_s7 + $0x590] sm:$0xff] }
  0xde   : > { %2429 = vmatpush.bf16.msra.mxu3 %v3875_v48  ;;  %v3903_v48 = vld [vmem:[%s4602_s7 + $0x5d8] sm:$0xff]  ;;  %v3902_v52 = vld [vmem:[%s4602_s7 + $0x5d0] sm:$0xff] }
  0xdf   : > { %2388 = vmatpush.bf16.msra.mxu0 %v3850_v53  ;;  %v3877_v53 = vld [vmem:[%s4602_s7 + $0x508] sm:$0xff] }
  0xe0   : > { %2402 = vmatpush.bf16.msra.mxu1 %v3858_v54  ;;  %v3885_v54 = vld [vmem:[%s4602_s7 + $0x548] sm:$0xff] }
  0xe1   : > { %2416 = vmatpush.bf16.msra.mxu2 %v3866_v55  ;;  %v3893_v55 = vld [vmem:[%s4602_s7 + $0x588] sm:$0xff] }
  0xe2   : > { %2430 = vmatpush.bf16.msra.mxu3 %v3874_v56  ;;  %v3901_v56 = vld [vmem:[%s4602_s7 + $0x5c8] sm:$0xff] }
  0xe3   : > { %2389 = vmatpush.bf16.msra.mxu0 %v3849_v57  ;;  %v3876_v57 = vld [vmem:[%s4602_s7 + $0x500] sm:$0xff] }
  0xe4   : > { %2403 = vmatpush.bf16.msra.mxu1 %v3857_v58  ;;  %v3884_v58 = vld [vmem:[%s4602_s7 + $0x540] sm:$0xff] }
  0xe5   : > { %2417 = vmatpush.bf16.msra.mxu2 %v3865_v59  ;;  %v3892_v59 = vld [vmem:[%s4602_s7 + $0x580] sm:$0xff] }
  0xe6   : > { %2431 = vmatpush.bf16.msra.mxu3 %v3873_v60  ;;  %v3900_v60 = vld [vmem:[%s4602_s7 + $0x5c0] sm:$0xff] }
  0xe7   : > { %2390 = vmatpush.bf16.msra.mxu0 %v3848_v61  ;;  %v2903_v61 = vld [vmem:[%s4595_s5 + $0x50] sm:$0xf] }
  0xe8   : > { %2404 = vmatpush.bf16.msra.mxu1 %v3856_v62  ;;  %v3714_v62 = vld [vmem:[%s4595_s5 + $0xac] sm:$0xf0] }
  0xe9   : > { %2418 = vmatpush.bf16.msra.mxu2 %v3864_v63  ;;  %v3702_v63 = vld [vmem:[%s4595_s5 + $0x54] sm:$0xf] }
  0xea   : > { %2432 = vmatpush.bf16.msra.mxu3 %v3872_v0  ;;  %v2905_v0 = vld [vmem:[%s4595_s5 + $0xb0] sm:$0xf0] }
  0xeb   : > { %2391 = vmatpush.bf16.msra.mxu0 %v3847_v1  ;;  %v2911_v1 = vld [vmem:[%s4595_s5 + $0x58] sm:$0xf] }
  0xec   : > { %2405 = vmatpush.bf16.msra.mxu1 %v3855_v2  ;;  %v3715_v2 = vld [vmem:[%s4595_s5 + $0xb4] sm:$0xf0] }
  0xed   : > { %2419 = vmatpush.bf16.msra.mxu2 %v3863_v3  ;;  %v3703_v3 = vld [vmem:[%s4595_s5 + $0x5c] sm:$0xf] }
  0xee   : > { %2433 = vmatpush.bf16.msra.mxu3 %v3871_v4  ;;  %v2913_v4 = vld [vmem:[%s4595_s5 + $0xb8] sm:$0xf0] }
  0xef   : > { %2392 = vmatpush.bf16.msra.mxu0 %v3846_v5  ;;  %v2904_v5 = vor.u32 %v3714_v62, %v2903_v61 }
  0xf0   : > { %2406 = vmatpush.bf16.msra.mxu1 %v3854_v6  ;;  %v2908_v6 = vor.u32 %v3702_v63, %v2905_v0 }
  0xf1   : > { %2420 = vmatpush.bf16.msra.mxu2 %v3862_v7  ;;  %v2912_v7 = vor.u32 %v3715_v2, %v2911_v1 }
  0xf2   : > { %2434 = vmatpush.bf16.msra.mxu3 %v3870_v8  ;;  %v2916_v8 = vor.u32 %v3703_v3, %v2913_v4 }
  0xf3   : > { %2393 = vmatpush.bf16.msra.mxu0 %v3845_v9 }
  0xf4   : > { %2407 = vmatpush.bf16.msra.mxu1 %v3853_v10 }
  0xf5   : > { %2421 = vmatpush.bf16.msra.mxu2 %v3861_v11 }
  0xf6   : > { %2435 = vmatpush.bf16.msra.mxu3 %v3869_v12 }
  0xf7   : > { %2394 = vmatpush.bf16.msra.mxu0 %v3844_v13  ;;  %v2172_v9 = vpop.f32.mrf.mxu0 }
  0xf8   : > { %2408 = vmatpush.bf16.msra.mxu1 %v3852_v14  ;;  %v2186_v10 = vpop.f32.mrf.mxu1 }
  0xf9   : > { %2422 = vmatpush.bf16.msra.mxu2 %v3860_v15  ;;  %v2187_v22 = vadd.f32 %v2186_v10, %v2172_v9 }
  0xfa   : > { %2436 = vmatpush.bf16.msra.mxu3 %v3868_v16  ;;  %2395 = vmatmul.bf16.vlgmr.msra.gmra.mxu0 %v2888_v29 }
  0xfb   : > { %2443 = vmatpush.bf16.msrb.mxu0 %v3883_v17  ;;  %2409 = vmatmul.bf16.vlgmr.msra.gmra.mxu1 %v2892_v31 }
  0xfc   : > { %2457 = vmatpush.bf16.msrb.mxu1 %v3891_v18  ;;  %2423 = vmatmul.bf16.vlgmr.msra.gmra.mxu2 %v2896_v30 }
  0xfd   : > { %2471 = vmatpush.bf16.msrb.mxu2 %v3899_v27  ;;  %2437 = vmatmul.bf16.vlgmr.msra.gmra.mxu3 %v2900_v32 }
  0xfe   : > { %2485 = vmatpush.bf16.msrb.mxu3 %v3907_v28 }
  0xff   : > { %2444 = vmatpush.bf16.msrb.mxu0 %v3882_v33  ;;  %v2200_v11 = vpop.f32.mrf.mxu2  ;;  %v2174_v13 = vpop.f32.mrf.mxu0 }
 0x100   : > { %2458 = vmatpush.bf16.msrb.mxu1 %v3890_v34  ;;  %v2214_v12 = vpop.f32.mrf.mxu3  ;;  %v2188_v14 = vpop.f32.mrf.mxu1  ;;  %v2201_v24 = vadd.f32 %v2200_v11, %v2187_v22 }
 0x101   : > { %2472 = vmatpush.bf16.msrb.mxu2 %v3898_v35  ;;  %v2189_v30 = vadd.f32 %v2188_v14, %v2174_v13 }
 0x102   : > { %2486 = vmatpush.bf16.msrb.mxu3 %v3906_v36  ;;  %v2215_v28 = vadd.f32 %v2214_v12, %v2201_v24 }
 0x103   : > { %2445 = vmatpush.bf16.msrb.mxu0 %v3881_v37 }
 0x104   : > { %2459 = vmatpush.bf16.msrb.mxu1 %v3889_v38 }
 0x105   : > { %2473 = vmatpush.bf16.msrb.mxu2 %v3897_v39 }
 0x106   : > { %2487 = vmatpush.bf16.msrb.mxu3 %v3905_v40 }
 0x107   : > { %2446 = vmatpush.bf16.msrb.mxu0 %v3880_v41  ;;  %v2202_v15 = vpop.f32.mrf.mxu2 }
 0x108   : > { %2460 = vmatpush.bf16.msrb.mxu1 %v3888_v42  ;;  %v2216_v16 = vpop.f32.mrf.mxu3  ;;  %v2203_v34 = vadd.f32 %v2202_v15, %v2189_v30 }
 0x109   : > { %2474 = vmatpush.bf16.msrb.mxu2 %v3896_v43 }
 0x10a   : > { %2488 = vmatpush.bf16.msrb.mxu3 %v3904_v44  ;;  %v2217_v38 = vadd.f32 %v2216_v16, %v2203_v34 }
 0x10b   : > { %2447 = vmatpush.bf16.msrb.mxu0 %v3879_v45 }
 0x10c   : > { %2461 = vmatpush.bf16.msrb.mxu1 %v3887_v46 }
 0x10d   : > { %2475 = vmatpush.bf16.msrb.mxu2 %v3895_v47 }
 0x10e   : > { %2489 = vmatpush.bf16.msrb.mxu3 %v3903_v48 }
 0x10f   : > { %2448 = vmatpush.bf16.msrb.mxu0 %v3878_v49 }
 0x110   : > { %2462 = vmatpush.bf16.msrb.mxu1 %v3886_v50 }
 0x111   : > { %2476 = vmatpush.bf16.msrb.mxu2 %v3894_v51 }
 0x112   : > { %2490 = vmatpush.bf16.msrb.mxu3 %v3902_v52 }
 0x113   : > { %2449 = vmatpush.bf16.msrb.mxu0 %v3877_v53 }
 0x114   : > { %2463 = vmatpush.bf16.msrb.mxu1 %v3885_v54 }
 0x115   : > { %2477 = vmatpush.bf16.msrb.mxu2 %v3893_v55 }
 0x116   : > { %2491 = vmatpush.bf16.msrb.mxu3 %v3901_v56 }
 0x117   : > { %2450 = vmatpush.bf16.msrb.mxu0 %v3876_v57  ;;  %v2228_v17 = vpop.f32.mrf.mxu0 }
 0x118   : > { %2464 = vmatpush.bf16.msrb.mxu1 %v3884_v58  ;;  %v2242_v18 = vpop.f32.mrf.mxu1  ;;  %v2229_v31 = vadd.f32 %v2228_v17, %v2215_v28 }
 0x119   : > { %2478 = vmatpush.bf16.msrb.mxu2 %v3892_v59 }
 0x11a   : > { %2492 = vmatpush.bf16.msrb.mxu3 %v3900_v60  ;;  %2451 = vmatmul.bf16.vlgmr.msrb.gmra.mxu0 %v2904_v5  ;;  %v2243_v35 = vadd.f32 %v2242_v18, %v2229_v31  ;;  %v481_v31 = vld [vmem:[#allocation2] sm:$0xff] }
 0x11b   : > { %2465 = vmatmul.bf16.vlgmr.msrb.gmra.mxu1 %v2908_v6 }
 0x11c   : > { %2479 = vmatmul.bf16.vlgmr.msrb.gmra.mxu2 %v2912_v7 }
 0x11d   : > { %2493 = vmatmul.bf16.vlgmr.msrb.gmra.mxu3 %v2916_v8 }
 0x11f   : > { %v2256_v19 = vpop.f32.mrf.mxu2  ;;  %v2230_v21 = vpop.f32.mrf.mxu0 }
 0x120   : > { %v2270_v20 = vpop.f32.mrf.mxu3  ;;  %v2244_v23 = vpop.f32.mrf.mxu1  ;;  %v2257_v39 = vadd.f32 %v2256_v19, %v2243_v35  ;;  %v2231_v40 = vadd.f32 %v2230_v21, %v2217_v38 }
 0x122   : > { %v2271_v43 = vadd.f32 %v2270_v20, %v2257_v39  ;;  %v2245_v45 = vadd.f32 %v2244_v23, %v2231_v40  ;;  %v482_v39 = vld [vmem:[#allocation2 + $0x8] sm:$0xff] }
 0x127   : > { %v2258_v25 = vpop.f32.mrf.mxu2 }
 0x128   : > { %v2272_v26 = vpop.f32.mrf.mxu3  ;;  %v2259_v48 = vadd.f32 %v2258_v25, %v2245_v45 }
 0x12a   : > { %v2273_v52 = vadd.f32 %v2272_v26, %v2259_v48 }
 0x137   : > { %v2284_v27 = vpop.f32.mrf.mxu0 }
 0x138   : > { %v2298_v29 = vpop.f32.mrf.mxu1  ;;  %v2285_v46 = vadd.f32 %v2284_v27, %v2271_v43 }
 0x13a   : > { %v2299_v49 = vadd.f32 %v2298_v29, %v2285_v46 }
 0x13f   : > { %v2312_v32 = vpop.f32.mrf.mxu2  ;;  %v2286_v36 = vpop.f32.mrf.mxu0 }
 0x140   : > { %v2326_v33 = vpop.f32.mrf.mxu3  ;;  %v2300_v37 = vpop.f32.mrf.mxu1  ;;  %v2313_v53 = vadd.f32 %v2312_v32, %v2299_v49  ;;  %v2287_v54 = vadd.f32 %v2286_v36, %v2273_v52 }
 0x142   : > { %v2327_v56 = vadd.f32 %v2326_v33, %v2313_v53  ;;  %v2301_v58 = vadd.f32 %v2300_v37, %v2287_v54 }
 0x147   : > { %v2314_v41 = vpop.f32.mrf.mxu2 }
 0x148   : > { %v2328_v42 = vpop.f32.mrf.mxu3  ;;  %v2315_v60 = vadd.f32 %v2314_v41, %v2301_v58 }
 0x14a   : > { %v2329_v1 = vadd.f32 %v2328_v42, %v2315_v60 }
 0x157   : > { %v2340_v44 = vpop.f32.mrf.mxu0 }
 0x158   : > { %v2354_v47 = vpop.f32.mrf.mxu1  ;;  %v2341_v59 = vadd.f32 %v2340_v44, %v2327_v56 }
 0x15a   : > { %v2355_v63 = vadd.f32 %v2354_v47, %v2341_v59 }
 0x15f   : > { %v2368_v50 = vpop.f32.mrf.mxu2  ;;  %v2342_v55 = vpop.f32.mrf.mxu0 }
 0x160   : > { %v2382_v51 = vpop.f32.mrf.mxu3  ;;  %v2356_v57 = vpop.f32.mrf.mxu1  ;;  %v2369_v2 = vadd.f32 %v2368_v50, %v2355_v63  ;;  %v2343_v4 = vadd.f32 %v2342_v55, %v2329_v1 }
 0x162   : > { %v2383_v5 = vadd.f32 %v2382_v51, %v2369_v2  ;;  %v2357_v8 = vadd.f32 %v2356_v57, %v2343_v4 }
 0x167   : > { %v2370_v61 = vpop.f32.mrf.mxu2 }
 0x168   : > { %v2384_v62 = vpop.f32.mrf.mxu3  ;;  %v2371_v10 = vadd.f32 %v2370_v61, %v2357_v8 }
 0x16a   : > { %v2385_v14 = vadd.f32 %v2384_v62, %v2371_v10 }
 0x177   : > { %v2396_v0 = vpop.f32.mrf.mxu0 }
 0x178   : > { %v2410_v3 = vpop.f32.mrf.mxu1  ;;  %v2397_v9 = vadd.f32 %v2396_v0, %v2383_v5 }
 0x17a   : > { %v2411_v12 = vadd.f32 %v2410_v3, %v2397_v9 }
 0x17f   : > { %v2424_v6 = vpop.f32.mrf.mxu2  ;;  %v2398_v11 = vpop.f32.mrf.mxu0 }
 0x180   : > { %v2438_v7 = vpop.f32.mrf.mxu3  ;;  %v2412_v13 = vpop.f32.mrf.mxu1  ;;  %v2425_v15 = vadd.f32 %v2424_v6, %v2411_v12  ;;  %v2399_v16 = vadd.f32 %v2398_v11, %v2385_v14 }
 0x182   : > { %v2439_v19 = vadd.f32 %v2438_v7, %v2425_v15  ;;  %v2413_v21 = vadd.f32 %v2412_v13, %v2399_v16 }
 0x187   : > { %v2426_v17 = vpop.f32.mrf.mxu2 }
 0x188   : > { %v2440_v18 = vpop.f32.mrf.mxu3  ;;  %v2427_v24 = vadd.f32 %v2426_v17, %v2413_v21 }
 0x18a   : > { %v2441_v28 = vadd.f32 %v2440_v18, %v2427_v24 }
 0x197   : > { %v2452_v20 = vpop.f32.mrf.mxu0 }
 0x198   : > { %v2453_v22 = vadd.f32 %v2452_v20, %v2439_v19  ;;  %v2466_v23 = vpop.f32.mrf.mxu1 }
 0x19a   : > { %v2467_v25 = vadd.f32 %v2466_v23, %v2453_v22 }
 0x19f   : > { %v2480_v26 = vpop.f32.mrf.mxu2  ;;  %v2454_v30 = vpop.f32.mrf.mxu0 }
 0x1a0   : > { %v2494_v27 = vpop.f32.mrf.mxu3  ;;  %v2481_v29 = vadd.f32 %v2480_v26, %v2467_v25  ;;  %v2455_v33 = vadd.f32 %v2454_v30, %v2441_v28  ;;  %v2468_v35 = vpop.f32.mrf.mxu1 }
 0x1a2   : > { %v2495_v32 = vadd.f32 %v2494_v27, %v2481_v29  ;;  %v2469_v36 = vadd.f32 %v2468_v35, %v2455_v33 }
 0x1a4   : > { %v2499_v34 = vadd.f32 %v2495_v32, %v481_v31 }
 0x1a6   : > { %2501 = vst [vmem:[#allocation2] sm:$0xff] %v2499_v34 }
 0x1a7   : > { %v2482_v37 = vpop.f32.mrf.mxu2 }
 0x1a8   : > { %v2483_v38 = vadd.f32 %v2482_v37, %v2469_v36  ;;  %v2496_v40 = vpop.f32.mrf.mxu3 }
 0x1aa   : > { %v2497_v41 = vadd.f32 %v2496_v40, %v2483_v38  ;;  %2506 = sbr.rel (%p3685_p1) target bundleno = 866 (0x362), region = 92 }
 0x1ac   : > { %v2500_v42 = vadd.f32 %v2497_v41, %v482_v39 }
 0x1ae   : > { %2502 = vst [vmem:[#allocation2 + $0x8] sm:$0xff] %v2500_v42 }
 0x1af   : > { %v2524_v43 = vld [vmem:[#allocation8 + $0x78] sm:$0xff]  ;;  %v2523_v44 = vld [vmem:[#allocation8 + $0x70] sm:$0xff]  ;;  %v2522_v45 = vld [vmem:[#allocation8 + $0x68] sm:$0xff] }
 0x1b0   : > { %2529 = vmatpush.msra.mxu0 %v2524_v43  ;;  %3908 = vmatpush.msra.mxu3 %v2524_v43  ;;  %v2521_v46 = vld [vmem:[#allocation8 + $0x60] sm:$0xff]  ;;  %v2520_v47 = vld [vmem:[#allocation8 + $0x58] sm:$0xff]  ;;  %v2519_v50 = vld [vmem:[#allocation8 + $0x50] sm:$0xff] }
 0x1b1   : > { %v2569_v48 = vld [vmem:[#allocation11 + $0x78] sm:$0xff]  ;;  %v2568_v49 = vld [vmem:[#allocation11 + $0x70] sm:$0xff]  ;;  %v2567_v51 = vld [vmem:[#allocation11 + $0x68] sm:$0xff] }
 0x1b2   : > { %2530 = vmatpush.msra.mxu0 %v2523_v44  ;;  %3909 = vmatpush.msra.mxu3 %v2523_v44  ;;  %v2518_v52 = vld [vmem:[#allocation8 + $0x48] sm:$0xff]  ;;  %v2517_v54 = vld [vmem:[#allocation8 + $0x40] sm:$0xff]  ;;  %v2516_v56 = vld [vmem:[#allocation8 + $0x38] sm:$0xff] }
 0x1b3   : > { %2574 = vmatpush.msra.mxu1 %v2569_v48  ;;  %v2566_v53 = vld [vmem:[#allocation11 + $0x60] sm:$0xff]  ;;  %v2565_v55 = vld [vmem:[#allocation11 + $0x58] sm:$0xff]  ;;  %v2564_v57 = vld [vmem:[#allocation11 + $0x50] sm:$0xff] }
 0x1b4   : > { %2531 = vmatpush.msra.mxu0 %v2522_v45  ;;  %3910 = vmatpush.msra.mxu3 %v2522_v45  ;;  %v2515_v58 = vld [vmem:[#allocation8 + $0x30] sm:$0xff]  ;;  %v2514_v60 = vld [vmem:[#allocation8 + $0x28] sm:$0xff]  ;;  %v2513_v62 = vld [vmem:[#allocation8 + $0x20] sm:$0xff] }
 0x1b5   : > { %2575 = vmatpush.msra.mxu1 %v2568_v49  ;;  %v2563_v59 = vld [vmem:[#allocation11 + $0x48] sm:$0xff]  ;;  %v2562_v61 = vld [vmem:[#allocation11 + $0x40] sm:$0xff]  ;;  %v2561_v63 = vld [vmem:[#allocation11 + $0x38] sm:$0xff] }
 0x1b6   : > { %2532 = vmatpush.msra.mxu0 %v2521_v46  ;;  %3911 = vmatpush.msra.mxu3 %v2521_v46  ;;  %v2512_v0 = vld [vmem:[#allocation8 + $0x18] sm:$0xff]  ;;  %v2511_v2 = vld [vmem:[#allocation8 + $0x10] sm:$0xff]  ;;  %v2510_v4 = vld [vmem:[#allocation8 + $0x8] sm:$0xff] }
 0x1b7   : > { %2576 = vmatpush.msra.mxu1 %v2567_v51  ;;  %v2560_v1 = vld [vmem:[#allocation11 + $0x30] sm:$0xff]  ;;  %v2559_v3 = vld [vmem:[#allocation11 + $0x28] sm:$0xff]  ;;  %v2558_v5 = vld [vmem:[#allocation11 + $0x20] sm:$0xff] }
 0x1b8   : > { %2533 = vmatpush.msra.mxu0 %v2520_v47  ;;  %3912 = vmatpush.msra.mxu3 %v2520_v47  ;;  %v2509_v6 = vld [vmem:[#allocation8] sm:$0xff]  ;;  %v2507_v7 = vld [vmem:[#allocation2] sm:$0xff]  ;;  %v2508_v8 = vld [vmem:[#allocation2 + $0x8] sm:$0xff] }
 0x1b9   : > { %2577 = vmatpush.msra.mxu1 %v2566_v53  ;;  %v2557_v9 = vld [vmem:[#allocation11 + $0x18] sm:$0xff]  ;;  %v2556_v10 = vld [vmem:[#allocation11 + $0x10] sm:$0xff]  ;;  %v2555_v11 = vld [vmem:[#allocation11 + $0x8] sm:$0xff] }
 0x1ba   : > { %2534 = vmatpush.msra.mxu0 %v2519_v50  ;;  %3913 = vmatpush.msra.mxu3 %v2519_v50  ;;  %v2554_v12 = vld [vmem:[#allocation11] sm:$0xff]  ;;  %v2613_v14 = vld [vmem:[#allocation14 + $0x70] sm:$0xff]  ;;  %v2612_v15 = vld [vmem:[#allocation14 + $0x68] sm:$0xff] }
 0x1bb   : > { %2578 = vmatpush.msra.mxu1 %v2565_v55  ;;  %v2614_v13 = vld [vmem:[#allocation14 + $0x78] sm:$0xff]  ;;  %v2611_v16 = vld [vmem:[#allocation14 + $0x60] sm:$0xff]  ;;  %v2609_v18 = vld [vmem:[#allocation14 + $0x50] sm:$0xff] }
 0x1bc   : > { %2535 = vmatpush.msra.mxu0 %v2518_v52  ;;  %3914 = vmatpush.msra.mxu3 %v2518_v52  ;;  %v2610_v17 = vld [vmem:[#allocation14 + $0x58] sm:$0xff]  ;;  %v2608_v19 = vld [vmem:[#allocation14 + $0x48] sm:$0xff]  ;;  %v2607_v20 = vld [vmem:[#allocation14 + $0x40] sm:$0xff] }
 0x1bd   : > { %2579 = vmatpush.msra.mxu1 %v2564_v57  ;;  %2619 = vmatpush.msra.mxu2 %v2614_v13  ;;  %v2606_v21 = vld [vmem:[#allocation14 + $0x38] sm:$0xff]  ;;  %v2605_v23 = vld [vmem:[#allocation14 + $0x30] sm:$0xff]  ;;  %v2604_v24 = vld [vmem:[#allocation14 + $0x28] sm:$0xff] }
 0x1be   : > { %2536 = vmatpush.msra.mxu0 %v2517_v54  ;;  %3915 = vmatpush.msra.mxu3 %v2517_v54  ;;  %v4066_v22 = vld [vmem:[#allocation9] ss:$0 sm:$0xff]  ;;  %v2603_v27 = vld [vmem:[#allocation14 + $0x20] sm:$0xff]  ;;  %v2601_v33 = vld [vmem:[#allocation14 + $0x10] sm:$0xff] }
 0x1bf   : > { %2580 = vmatpush.msra.mxu1 %v2563_v59  ;;  %2620 = vmatpush.msra.mxu2 %v2613_v14  ;;  %v2602_v29 = vld [vmem:[#allocation14 + $0x18] sm:$0xff]  ;;  %v2600_v34 = vld [vmem:[#allocation14 + $0x8] sm:$0xff]  ;;  %v2599_v35 = vld [vmem:[#allocation14] sm:$0xff] }
 0x1c0   : > { %2537 = vmatpush.msra.mxu0 %v2516_v56  ;;  %3916 = vmatpush.msra.mxu3 %v2516_v56  ;;  %v4067_v36 = vld [vmem:[#allocation12] ss:$0 sm:$0xff]  ;;  %v4068_v43 = vld [vmem:[#allocation15] ss:$0 sm:$0xff] }
 0x1c1   : > { %2581 = vmatpush.msra.mxu1 %v2562_v61  ;;  %2621 = vmatpush.msra.mxu2 %v2612_v15 }
 0x1c2   : > { %2538 = vmatpush.msra.mxu0 %v2515_v58  ;;  %3917 = vmatpush.msra.mxu3 %v2515_v58 }
 0x1c3   : > { %2582 = vmatpush.msra.mxu1 %v2561_v63  ;;  %2622 = vmatpush.msra.mxu2 %v2611_v16 }
 0x1c4   : > { %2539 = vmatpush.msra.mxu0 %v2514_v60  ;;  %3918 = vmatpush.msra.mxu3 %v2514_v60 }
 0x1c5   : > { %2583 = vmatpush.msra.mxu1 %v2560_v1  ;;  %2623 = vmatpush.msra.mxu2 %v2610_v17 }
 0x1c6   : > { %2540 = vmatpush.msra.mxu0 %v2513_v62  ;;  %3919 = vmatpush.msra.mxu3 %v2513_v62 }
 0x1c7   : > { %2584 = vmatpush.msra.mxu1 %v2559_v3  ;;  %2624 = vmatpush.msra.mxu2 %v2609_v18 }
 0x1c8   : > { %2541 = vmatpush.msra.mxu0 %v2512_v0  ;;  %3920 = vmatpush.msra.mxu3 %v2512_v0 }
 0x1c9   : > { %2585 = vmatpush.msra.mxu1 %v2558_v5  ;;  %2625 = vmatpush.msra.mxu2 %v2608_v19 }
 0x1ca   : > { %2542 = vmatpush.msra.mxu0 %v2511_v2  ;;  %3921 = vmatpush.msra.mxu3 %v2511_v2 }
 0x1cb   : > { %2586 = vmatpush.msra.mxu1 %v2557_v9  ;;  %2626 = vmatpush.msra.mxu2 %v2607_v20 }
 0x1cc   : > { %2543 = vmatpush.msra.mxu0 %v2510_v4  ;;  %3922 = vmatpush.msra.mxu3 %v2510_v4 }
 0x1cd   : > { %2587 = vmatpush.msra.mxu1 %v2556_v10  ;;  %2627 = vmatpush.msra.mxu2 %v2606_v21 }
 0x1ce   : > { %2544 = vmatpush.msra.mxu0 %v2509_v6  ;;  %3923 = vmatpush.msra.mxu3 %v2509_v6 }
 0x1cf   : > { %2545 = vmatmul.f32.vlgmr.msra.gmra.mxu0 %v2507_v7  ;;  %2548 = vmatmul.f32.vlgmr.msra.gmra.mxu3 %v2508_v8 }
 0x1d0   : > { %2588 = vmatpush.msra.mxu1 %v2555_v11  ;;  %2628 = vmatpush.msra.mxu2 %v2605_v23 }
 0x1d2   : > { %2589 = vmatpush.msra.mxu1 %v2554_v12  ;;  %2629 = vmatpush.msra.mxu2 %v2604_v24 }
 0x1d4   : > { %2630 = vmatpush.msra.mxu2 %v2603_v27 }
 0x1d6   : > { %2631 = vmatpush.msra.mxu2 %v2602_v29 }
 0x1d8   : > { %2632 = vmatpush.msra.mxu2 %v2601_v33 }
 0x1da   : > { %2633 = vmatpush.msra.mxu2 %v2600_v34 }
 0x1dc   : > { %2634 = vmatpush.msra.mxu2 %v2599_v35 }
 0x24c   : > { %v2546_v25 = vpop.f32.mrf.mxu0 }
 0x24d   : > { %v2547_v26 = vadd.f32 %v4066_v22, %v2546_v25 }
 0x24f   : > { %v2552_v28 = vmax.f32 %v2547_v26, 0.0 }
 0x251   : > { %2590 = vmatmul.f32.vlgmr.msra.gmra.mxu1 %v2552_v28 }
 0x252   : > { %v2549_v30 = vpop.f32.mrf.mxu3 }
 0x253   : > { %v2550_v31 = vadd.f32 %v4066_v22, %v2549_v30 }
 0x255   : > { %v2553_v32 = vmax.f32 %v2550_v31, 0.0 }
 0x259   : > { %2593 = vmatmul.f32.gmra.mxu1 %v2553_v32 }
 0x2ce   : > { %v2591_v37 = vpop.f32.mrf.mxu1 }
 0x2cf   : > { %v2592_v38 = vadd.f32 %v4067_v36, %v2591_v37 }
 0x2d1   : > { %v2597_v39 = vmax.f32 %v2592_v38, 0.0 }
 0x2d3   : > { %2635 = vmatmul.f32.vlgmr.msra.gmra.mxu2 %v2597_v39 }
 0x2d6   : > { %v2594_v40 = vpop.f32.mrf.mxu1 }
 0x2d7   : > { %v2595_v41 = vadd.f32 %v4067_v36, %v2594_v40 }
 0x2d9   : > { %v2598_v42 = vmax.f32 %v2595_v41, 0.0 }
 0x2db   : > { %2638 = vmatmul.f32.gmra.mxu2 %v2598_v42 }
 0x356   : > { %v2636_v44 = vpop.f32.mrf.mxu2 }
 0x357   : > { %v2637_v45 = vadd.f32 %v4068_v43, %v2636_v44 }
 0x359   : > { %2642 = vst [vmem:[#allocation17] sm:$0xff] %v2637_v45 }
 0x35e   : > { %v2639_v46 = vpop.f32.mrf.mxu2 }
 0x35f   : > { %v2640_v47 = vadd.f32 %v4068_v43, %v2639_v46 }
 0x361   : > { %2643 = vst [vmem:[#allocation17 + $0x8] sm:$0xff] %v2640_v47 }
 0x362 PF: > { %p3999_p3 = scmp.eq.s32.totalorder %s4506_s11, 3  ;;  %s2654_s20 = sshll.u32 %s4896_s8, 4  ;;  %s2655_s20 = int_to_ptr.hbm [resolvable:$true] %s2654_s20 }
 0x363   : > { %s4427_s22 = smov [#allocation17]   ;;  %s4428_s16 = smov 128  }
 0x364   : > { %s2652_s2 = sshll.u32 %s4427_s22, 4  ;;  %s4429_s19 = smov 8   ;;  %s2653_s2 = int_to_ptr.vmem [resolvable:$true] %s2652_s2 }
 0x365   : > { %3957 = dma.vmem_to_hbm [thread:$0]  (%p3999_p3), %s2653_s2, 256, %s2655_s20, [#allocation5], %s4428_s16, %s4428_s16, %s4429_s19  }
 0x366   : > { %4386 = dma.done.wait (%p3999_p3), [#allocation5], 256  }
 0x367   : > { %4388 = vsyncadd (%p3999_p3), [#allocation5], 4294967040 }
 0x368 PF: > { %s28_s10 = sadd.s32 1, %s4411_s10   ;;  %s4917_s11 = sld [smem:[#allocation25_spill]] }
 0x369   : > { %p25_p4 = scmp.ge.s32.totalorder %s28_s10, 6   ;;  %s4918_s27 = smov %s4395_s28 }
 0x36a   : > { %s4919_s28 = smov %s4399_s29  ;;  %s4920_s29 = smov %s4573_s24 }
 0x36b   : > { %s4921_s30 = smov %s4407_s9  ;;  %27 = sbr.rel (!%p25_p4) target bundleno = 18 (0x12), region = 135 }
 0x36e   : > { %s4922_s9 = smov %s4917_s11 }
 0x370   :  { %2671 = vsyncpa [#allocation4], 1 }
 0x371   :  { %2673 = vsyncpa [#allocation4 + $0x1], 1 }
 0x372   :  { %2674 = vsyncpa [#allocation7], 1 }
 0x373   :  { %2676 = vsyncpa [#allocation7 + $0x1], 1 }
 0x374   :  { %2677 = vsyncpa [#allocation10], 1 }
 0x375   :  { %2678 = vsyncpa [#allocation13], 1 }
 0x376   :  { %2679 = vsyncpa [#allocation16], 1 }
 0x377   :  { %2680 = vsyncpa [#allocation5], 1 }
 0x378   :  { %2682 = vsyncpa [#allocation5 + $0x1], 1 }

</bundles_post_ra>
